<compile_context>
chip_gen: v5e
topology: v5e:2x2
jax: 0.10.0
libtpu: 0.0.40
codegen_flags: <defaults>
</compile_context>

<pallas_src>
import math
import numpy as np
import jax
import jax.numpy as jnp
from jax.experimental import pallas as pl
from jax.experimental.pallas import tpu as pltpu


# --------------------------------------------------------------------------
# Rotation-operator construction (parameter setup, plain numpy — runs once).
# --------------------------------------------------------------------------
def _rotation_operator_matrix(kernel_size, theta, disk_mask=True):
    """Dense [H*W, H*W] bilinear-interpolation rotation operator (rotate by theta)."""
    H, W = kernel_size
    M = np.zeros((H * W, H * W), dtype=np.float32)
    cy, cx = (H - 1) / 2.0, (W - 1) / 2.0
    ct, st = math.cos(theta), math.sin(theta)
    radius = min(H, W) / 2.0
    for i in range(H):
        for j in range(W):
            yi, xj = i - cy, j - cx
            if disk_mask and (yi * yi + xj * xj) > radius * radius + 1e-9:
                continue  # spatially masked pixel -> zero row
            ys = ct * yi + st * xj + cy
            xs = -st * yi + ct * xj + cx
            y0, x0 = int(np.floor(ys)), int(np.floor(xs))
            wy, wx = ys - y0, xs - x0
            for dy, wyy in ((0, 1.0 - wy), (1, wy)):
                for dx, wxx in ((0, 1.0 - wx), (1, wx)):
                    yy, xx = y0 + dy, x0 + dx
                    if 0 <= yy < H and 0 <= xx < W and wyy * wxx != 0.0:
                        M[i * W + j, yy * W + xx] += wyy * wxx
    return M


def multi_rotation_operator_matrix(kernel_size, n_orient, periodicity=2 * np.pi,
                                   disk_mask=True):
    # TODO(synk): the exact bilinear / disk-mask conventions of the external
    # se2cnn `rotation.MultiRotationOperatorMatrixSparse` are approximated here.
    mats = [_rotation_operator_matrix(kernel_size, r * periodicity / n_orient, disk_mask)
            for r in range(n_orient)]
    return np.concatenate(mats, axis=0)  # [N*H*W, H*W]


# --------------------------------------------------------------------------
# Kernel rotation (mirrors rotate_lifting_kernels / rotate_gconv_kernels).
# --------------------------------------------------------------------------
def rotate_lifting_kernels(kernel, n_orient, periodicity=2 * np.pi, disk_mask=True):
    out_c, in_c, kh, kw = kernel.shape
    kernel_flat = kernel.reshape(in_c * out_c, kh * kw).T                  # [k*k, out*in]
    rot_op = jnp.asarray(multi_rotation_operator_matrix((kh, kw), n_orient,
                                                        periodicity, disk_mask))
    rotated = rot_op @ kernel_flat                                         # [N*k*k, out*in]
    rotated = rotated.reshape(n_orient, kh, kw, in_c, out_c)
    return jnp.transpose(rotated, (0, 4, 3, 1, 2))                         # [N, out_c, in_c, k, k]


def rotate_gconv_kernels(kernel, periodicity=2 * np.pi, disk_mask=True):
    N, out_c, in_c, kh, kw = kernel.shape
    kernel_flat = kernel.reshape(N * out_c * in_c, kh * kw).T              # [k*k, N*out*in]
    rot_op = jnp.asarray(multi_rotation_operator_matrix((kh, kw), N,
                                                        periodicity, disk_mask))
    kpr = (rot_op @ kernel_flat).reshape(N, kh, kw, N, out_c, in_c)
    kpr = jnp.transpose(kpr, (3, 4, 5, 0, 1, 2))                           # [t, o, i, r, h, w]
    outs = []
    for r in range(N):
        kt = kpr[:, :, :, r, :, :]                                         # [t, o, i, h, w]
        kt = jnp.transpose(kt, (1, 2, 3, 4, 0))                            # [o, i, h, w, t]
        kt = kt.reshape(kh * kw * in_c * out_c, N)
        roll = jnp.asarray(np.roll(np.identity(N), r, axis=1), jnp.float32)
        kt = kt @ roll                                                     # shift-twist
        kt = kt.reshape(out_c, in_c, kh, kw, N)
        outs.append(jnp.transpose(kt, (0, 1, 4, 2, 3)))                    # [o, i, N, k, k]
    return jnp.stack(outs)                                                 # [N, o, i, N, k, k]


# --------------------------------------------------------------------------
# Fused Pallas kernel: conv -> BN/LReLU -> conv -> BN/LReLU -> max -> BN2/LReLU
# --------------------------------------------------------------------------
def _fused_roto_decoder(xpf, wl, wg, g1, b1, g2, b2, mask, *,
                        B, H, W, Wp, Lseg, k, pad, in_c, Ntheta, out_c):
    NC = Ntheta * out_c
    KK = k * k
    BL = B * Lseg
    # staging margin >= max |shifted-slice offset|, rounded up to lane alignment
    MARG = ((pad * Wp + pad + 127) // 128) * 128
    XLEN = BL + 2 * MARG
    SRC_ROWS = max(in_c, NC)
    PATCH_ROWS = KK * max(in_c, NC)
    inv_count = 1.0 / float(B * H * W)
    EPS, SLOPE = 1e-5, 0.2

    def kernel(x_ref, wl_ref, wg_ref, g1_ref, b1_ref, g2_ref, b2_ref,
               m_ref, o_ref, src_ref, patch_ref):
        msk = m_ref[...]                                        # [1, BL]

        # Zero the staging buffer once so its margins always read as exact zeros
        # (out-of-range taps of the shifted slices land there).
        src_ref[...] = jnp.zeros_like(src_ref)

        def conv_same(x_val, w_b16, cin):
            """'same' conv in padded-flat layout, as ONE bf16 MXU matmul
               [Cout, k*k*cin] @ [k*k*cin, B*Lseg] (K and batch fully folded)."""
            src_ref[0:cin, MARG:MARG + BL] = x_val
            for t in range(KK):                                 # unrolled, static slices
                dy, dx = t // k, t % k
                d = (dy - pad) * Wp + (dx - pad)                # flat-layout tap offset
                patch_ref[t * cin:(t + 1) * cin, :] = (
                    src_ref[0:cin, MARG + d:MARG + d + BL])
            patches = patch_ref[0:KK * cin, :].astype(jnp.bfloat16)
            return jnp.dot(w_b16, patches,
                           preferred_element_type=jnp.float32)  # [Cout, BL] f32

        def bn_lrelu(y, g_ref_, b_ref_):
            """training-mode BatchNorm2d (batch stats over B,H,W, biased var) +
               LeakyReLU(0.2); stats use only valid pixels; output re-zeroed at the
               padding ring / lane tail so it can feed the next 'same' conv."""
            s = jnp.sum(y * msk, axis=1, keepdims=True)         # [C, 1]
            ss = jnp.sum(y * y * msk, axis=1, keepdims=True)
            mean = s * inv_count
            var = ss * inv_count - mean * mean
            scale = g_ref_[...] * jax.lax.rsqrt(var + EPS)
            shift = b_ref_[...] - mean * scale
            z = y * scale + shift
            z = jnp.where(z >= 0, z, SLOPE * z)
            return z * msk

        # ---- stage 1: lifting conv (Z2 -> SE2N) + BN + LeakyReLU ----
        y = conv_same(x_ref[...], wl_ref[...], in_c)            # [NC, BL]
        y = bn_lrelu(y, g1_ref, b1_ref)

        # ---- stage 2: group conv (SE2N -> SE2N) + BN + LeakyReLU ----
        # (same bn gamma/beta: the PyTorch module reuses self.bn for both stages)
        y = conv_same(y, wg_ref[...], NC)                       # [NC, BL]
        y = bn_lrelu(y, g1_ref, b1_ref)

        # ---- stage 3: max over orientations + BN2 + LeakyReLU ----
        mx = y[0:out_c, :]
        for n in range(1, Ntheta):
            mx = jnp.maximum(mx, y[n * out_c:(n + 1) * out_c, :])
        o_ref[...] = bn_lrelu(mx, g2_ref, b2_ref)

    return pl.pallas_call(
        kernel,
        out_shape=jax.ShapeDtypeStruct((out_c, BL), jnp.float32),
        grid=(1,),
        in_specs=[
            pl.BlockSpec((in_c, BL), lambda i: (0, 0)),
            pl.BlockSpec((NC, KK * in_c), lambda i: (0, 0)),
            pl.BlockSpec((NC, KK * NC), lambda i: (0, 0)),
            pl.BlockSpec((NC, 1), lambda i: (0, 0)),
            pl.BlockSpec((NC, 1), lambda i: (0, 0)),
            pl.BlockSpec((out_c, 1), lambda i: (0, 0)),
            pl.BlockSpec((out_c, 1), lambda i: (0, 0)),
            pl.BlockSpec((1, BL), lambda i: (0, 0)),
        ],
        out_specs=pl.BlockSpec((out_c, BL), lambda i: (0, 0)),
        scratch_shapes=[pltpu.VMEM((SRC_ROWS, XLEN), jnp.float32),
                        pltpu.VMEM((PATCH_ROWS, BL), jnp.float32)],
        compiler_params=pltpu.CompilerParams(
            dimension_semantics=("arbitrary",)),
    )(xpf, wl, wg, g1, b1, g2, b2, mask)


# --------------------------------------------------------------------------
# roto_decoder_block
# --------------------------------------------------------------------------
def init_params(key, in_c, out_c, kernel_size, Ntheta):
    k1, k2 = jax.random.split(key)
    lift = jax.random.normal(k1, (out_c, in_c, kernel_size, kernel_size), jnp.float32) \
        * math.sqrt(2.0 / (in_c * kernel_size * kernel_size))
    gconv = jax.random.normal(k2, (Ntheta, out_c, out_c, kernel_size, kernel_size),
                              jnp.float32) * math.sqrt(2.0 / (out_c * kernel_size * kernel_size))
    return dict(
        lift=lift,
        gconv=gconv,
        bn_gamma=jnp.ones((out_c * Ntheta,), jnp.float32),
        bn_beta=jnp.zeros((out_c * Ntheta,), jnp.float32),
        bn2_gamma=jnp.ones((out_c,), jnp.float32),
        bn2_beta=jnp.zeros((out_c,), jnp.float32),
    )


def roto_decoder_block_forward(params, x, Ntheta, out_c):
    B, in_c, H0, W0 = x.shape
    k = params['lift'].shape[-1]
    assert k % 2 == 1, "'same' padding path implemented for odd kernel sizes only"
    pad = (k - 1) // 2
    NC = Ntheta * out_c

    # 1) nearest 2x upsample (host glue; tiny).
    #    TODO(synk): fold the nearest-upsample into the kernel's patch gather.
    xu = jnp.repeat(jnp.repeat(x, 2, axis=2), 2, axis=3)
    H, W = 2 * H0, 2 * W0
    Hp, Wp = H + 2 * pad, W + 2 * pad
    Lseg = ((Hp * Wp + 127) // 128) * 128            # lane-aligned per-batch segment
    BL = B * Lseg

    # 2) rotated kernel stacks (parameter setup), folded to lane-dense
    #    [Cout, k*k*Cin] bf16 matrices (column order = (dy, dx, cin)).
    lift_stack = rotate_lifting_kernels(params['lift'], Ntheta)      # [N, out, in, k, k]
    w_lift = lift_stack.reshape(NC, in_c, k, k)
    g_stack = rotate_gconv_kernels(params['gconv'])                  # [N, o, i, N, k, k]
    w_g = g_stack.reshape(NC, NC, k, k)

    def fold_w(w):
        co, ci = w.shape[0], w.shape[1]
        return jnp.transpose(w, (0, 2, 3, 1)).reshape(co, k * k * ci).astype(jnp.bfloat16)

    wl = fold_w(w_lift)                                              # [NC, k*k*in_c]
    wg = fold_w(w_g)                                                 # [NC, k*k*NC]

    # 3) activation layout: zero-pad, flatten padded spatial on the lane axis,
    #    concatenate batches along the lane -> [Cin, B*Lseg]
    xp = jnp.pad(xu, ((0, 0), (0, 0), (pad, pad), (pad, pad)))
    xf = jnp.pad(xp.reshape(B, in_c, Hp * Wp),
                 ((0, 0), (0, 0), (0, Lseg - Hp * Wp)))
    xpf = jnp.transpose(xf, (1, 0, 2)).reshape(in_c, BL)

    # 4) validity mask: 1 at interior pixels, 0 at padding ring / lane tail
    vy = (np.arange(Hp) >= pad) & (np.arange(Hp) < pad + H)
    vx = (np.arange(Wp) >= pad) & (np.arange(Wp) < pad + W)
    v = (vy[:, None] & vx[None, :]).astype(np.float32).reshape(-1)
    mseg = np.concatenate([v, np.zeros(Lseg - Hp * Wp, np.float32)])
    mask = jnp.asarray(np.tile(mseg, B)).reshape(1, BL)

    g1 = params['bn_gamma'].reshape(NC, 1).astype(jnp.float32)
    b1 = params['bn_beta'].reshape(NC, 1).astype(jnp.float32)
    g2 = params['bn2_gamma'].reshape(out_c, 1).astype(jnp.float32)
    b2 = params['bn2_beta'].reshape(out_c, 1).astype(jnp.float32)

    out_flat = _fused_roto_decoder(xpf, wl, wg, g1, b1, g2, b2, mask,
                                   B=B, H=H, W=W, Wp=Wp, Lseg=Lseg, k=k, pad=pad,
                                   in_c=in_c, Ntheta=Ntheta, out_c=out_c)

    # 5) extract valid pixels back into NCHW
    o = out_flat.reshape(out_c, B, Lseg)[:, :, :Hp * Wp].reshape(out_c, B, Hp, Wp)
    o = o[:, :, pad:pad + H, pad:pad + W]
    return jnp.transpose(o, (1, 0, 2, 3))                            # [B, out_c, H, W]


if __name__ == "__main__":
    key = jax.random.PRNGKey(0)
    kx, kp = jax.random.split(key)

    B, in_c, out_c, kernel_size, Ntheta = 2, 4, 4, 3, 4
    H = W = 8   # -> 16x16 after the x2 upsample

    x = jax.random.normal(kx, (B, in_c, H, W), jnp.float32)
    params = init_params(kp, in_c, out_c, kernel_size, Ntheta)

    y = roto_decoder_block_forward(params, x, Ntheta, out_c)
    y = jax.block_until_ready(y)
    assert y.shape == (B, out_c, 2 * H, 2 * W), y.shape
    assert bool(jnp.all(jnp.isfinite(y)))
    print("KERNEL_OK")
</pallas_src>

<mosaic_0001>
module attributes {stable_mosaic.version = 11 : i64} {
  func.func @kernel(%arg0: i32, %arg1: memref<4x768xf32, #tpu.memory_space<vmem>>, %arg2: memref<16x36xbf16, #tpu.memory_space<vmem>>, %arg3: memref<16x144xbf16, #tpu.memory_space<vmem>>, %arg4: memref<16x1xf32, #tpu.memory_space<vmem>>, %arg5: memref<16x1xf32, #tpu.memory_space<vmem>>, %arg6: memref<4x1xf32, #tpu.memory_space<vmem>>, %arg7: memref<4x1xf32, #tpu.memory_space<vmem>>, %arg8: memref<1x768xf32, #tpu.memory_space<vmem>>, %arg9: memref<4x768xf32, #tpu.memory_space<vmem>>, %arg10: memref<16x1024xf32, #tpu.memory_space<vmem>>, %arg11: memref<144x768xf32, #tpu.memory_space<vmem>>) attributes {dimension_semantics = [#tpu.dimension_semantics<arbitrary>], iteration_bounds = array<i64: 1>, scalar_prefetch = 0 : i64, scratch_operands = 2 : i64, tpu.core_type = #tpu.core_type<tc>, window_params = [{pipeline_mode = #tpu.pipeline_mode<synchronous>, transform_indices = @transform_0, window_bounds = array<i64: 4, 768>}, {pipeline_mode = #tpu.pipeline_mode<synchronous>, transform_indices = @transform_1, window_bounds = array<i64: 16, 36>}, {pipeline_mode = #tpu.pipeline_mode<synchronous>, transform_indices = @transform_2, window_bounds = array<i64: 16, 144>}, {pipeline_mode = #tpu.pipeline_mode<synchronous>, transform_indices = @transform_3, window_bounds = array<i64: 16, 1>}, {pipeline_mode = #tpu.pipeline_mode<synchronous>, transform_indices = @transform_4, window_bounds = array<i64: 16, 1>}, {pipeline_mode = #tpu.pipeline_mode<synchronous>, transform_indices = @transform_5, window_bounds = array<i64: 4, 1>}, {pipeline_mode = #tpu.pipeline_mode<synchronous>, transform_indices = @transform_6, window_bounds = array<i64: 4, 1>}, {pipeline_mode = #tpu.pipeline_mode<synchronous>, transform_indices = @transform_7, window_bounds = array<i64: 1, 768>}, {pipeline_mode = #tpu.pipeline_mode<synchronous>, transform_indices = @transform_8, window_bounds = array<i64: 4, 768>}]} {
    %c0 = arith.constant 0 : index
    %c0_0 = arith.constant 0 : index
    %0 = vector.load %arg8[%c0, %c0_0] : memref<1x768xf32, #tpu.memory_space<vmem>>, vector<1x768xf32>
    %cst = arith.constant 0.000000e+00 : f32
    %1 = vector.broadcast %cst : f32 to vector<16x1024xf32>
    %c0_1 = arith.constant 0 : index
    %c0_2 = arith.constant 0 : index
    %2 = vector.load %arg10[%c0_1, %c0_2] : memref<16x1024xf32, #tpu.memory_space<vmem>>, vector<16x1024xf32>
    tpu.vector_store %arg10[%c0_1, %c0_2], %1 {strides = array<i32>} : memref<16x1024xf32, #tpu.memory_space<vmem>>, vector<16x1024xf32>,
    %c0_3 = arith.constant 0 : index
    %c0_4 = arith.constant 0 : index
    %3 = vector.load %arg1[%c0_3, %c0_4] : memref<4x768xf32, #tpu.memory_space<vmem>>, vector<4x768xf32>
    %c0_5 = arith.constant 0 : index
    %c0_6 = arith.constant 0 : index
    %4 = vector.load %arg2[%c0_5, %c0_6] : memref<16x36xbf16, #tpu.memory_space<vmem>>, vector<16x36xbf16>
    %c0_7 = arith.constant 0 : index
    %c128 = arith.constant 128 : index
    %5 = vector.load %arg10[%c0_7, %c128] : memref<16x1024xf32, #tpu.memory_space<vmem>>, vector<4x768xf32>
    tpu.vector_store %arg10[%c0_7, %c128], %3 {strides = array<i32>} : memref<16x1024xf32, #tpu.memory_space<vmem>>, vector<4x768xf32>,
    %c0_8 = arith.constant 0 : index
    %c109 = arith.constant 109 : index
    %6 = vector.load %arg10[%c0_8, %c109] : memref<16x1024xf32, #tpu.memory_space<vmem>>, vector<4x768xf32>
    %c0_9 = arith.constant 0 : index
    %c0_10 = arith.constant 0 : index
    %7 = vector.load %arg11[%c0_9, %c0_10] : memref<144x768xf32, #tpu.memory_space<vmem>>, vector<4x768xf32>
    tpu.vector_store %arg11[%c0_9, %c0_10], %6 {strides = array<i32>} : memref<144x768xf32, #tpu.memory_space<vmem>>, vector<4x768xf32>,
    %c0_11 = arith.constant 0 : index
    %c110 = arith.constant 110 : index
    %8 = vector.load %arg10[%c0_11, %c110] : memref<16x1024xf32, #tpu.memory_space<vmem>>, vector<4x768xf32>
    %c4 = arith.constant 4 : index
    %c0_12 = arith.constant 0 : index
    %9 = vector.load %arg11[%c4, %c0_12] : memref<144x768xf32, #tpu.memory_space<vmem>>, vector<4x768xf32>
    tpu.vector_store %arg11[%c4, %c0_12], %8 {strides = array<i32>} : memref<144x768xf32, #tpu.memory_space<vmem>>, vector<4x768xf32>,
    %c0_13 = arith.constant 0 : index
    %c111 = arith.constant 111 : index
    %10 = vector.load %arg10[%c0_13, %c111] : memref<16x1024xf32, #tpu.memory_space<vmem>>, vector<4x768xf32>
    %c8 = arith.constant 8 : index
    %c0_14 = arith.constant 0 : index
    %11 = vector.load %arg11[%c8, %c0_14] : memref<144x768xf32, #tpu.memory_space<vmem>>, vector<4x768xf32>
    tpu.vector_store %arg11[%c8, %c0_14], %10 {strides = array<i32>} : memref<144x768xf32, #tpu.memory_space<vmem>>, vector<4x768xf32>,
    %c0_15 = arith.constant 0 : index
    %c127 = arith.constant 127 : index
    %12 = vector.load %arg10[%c0_15, %c127] : memref<16x1024xf32, #tpu.memory_space<vmem>>, vector<4x768xf32>
    %c12 = arith.constant 12 : index
    %c0_16 = arith.constant 0 : index
    %13 = vector.load %arg11[%c12, %c0_16] : memref<144x768xf32, #tpu.memory_space<vmem>>, vector<4x768xf32>
    tpu.vector_store %arg11[%c12, %c0_16], %12 {strides = array<i32>} : memref<144x768xf32, #tpu.memory_space<vmem>>, vector<4x768xf32>,
    %c0_17 = arith.constant 0 : index
    %c128_18 = arith.constant 128 : index
    %14 = vector.load %arg10[%c0_17, %c128_18] : memref<16x1024xf32, #tpu.memory_space<vmem>>, vector<4x768xf32>
    %c16 = arith.constant 16 : index
    %c0_19 = arith.constant 0 : index
    %15 = vector.load %arg11[%c16, %c0_19] : memref<144x768xf32, #tpu.memory_space<vmem>>, vector<4x768xf32>
    tpu.vector_store %arg11[%c16, %c0_19], %14 {strides = array<i32>} : memref<144x768xf32, #tpu.memory_space<vmem>>, vector<4x768xf32>,
    %c0_20 = arith.constant 0 : index
    %c129 = arith.constant 129 : index
    %16 = vector.load %arg10[%c0_20, %c129] : memref<16x1024xf32, #tpu.memory_space<vmem>>, vector<4x768xf32>
    %c20 = arith.constant 20 : index
    %c0_21 = arith.constant 0 : index
    %17 = vector.load %arg11[%c20, %c0_21] : memref<144x768xf32, #tpu.memory_space<vmem>>, vector<4x768xf32>
    tpu.vector_store %arg11[%c20, %c0_21], %16 {strides = array<i32>} : memref<144x768xf32, #tpu.memory_space<vmem>>, vector<4x768xf32>,
    %c0_22 = arith.constant 0 : index
    %c145 = arith.constant 145 : index
    %18 = vector.load %arg10[%c0_22, %c145] : memref<16x1024xf32, #tpu.memory_space<vmem>>, vector<4x768xf32>
    %c24 = arith.constant 24 : index
    %c0_23 = arith.constant 0 : index
    %19 = vector.load %arg11[%c24, %c0_23] : memref<144x768xf32, #tpu.memory_space<vmem>>, vector<4x768xf32>
    tpu.vector_store %arg11[%c24, %c0_23], %18 {strides = array<i32>} : memref<144x768xf32, #tpu.memory_space<vmem>>, vector<4x768xf32>,
    %c0_24 = arith.constant 0 : index
    %c146 = arith.constant 146 : index
    %20 = vector.load %arg10[%c0_24, %c146] : memref<16x1024xf32, #tpu.memory_space<vmem>>, vector<4x768xf32>
    %c28 = arith.constant 28 : index
    %c0_25 = arith.constant 0 : index
    %21 = vector.load %arg11[%c28, %c0_25] : memref<144x768xf32, #tpu.memory_space<vmem>>, vector<4x768xf32>
    tpu.vector_store %arg11[%c28, %c0_25], %20 {strides = array<i32>} : memref<144x768xf32, #tpu.memory_space<vmem>>, vector<4x768xf32>,
    %c0_26 = arith.constant 0 : index
    %c147 = arith.constant 147 : index
    %22 = vector.load %arg10[%c0_26, %c147] : memref<16x1024xf32, #tpu.memory_space<vmem>>, vector<4x768xf32>
    %c32 = arith.constant 32 : index
    %c0_27 = arith.constant 0 : index
    %23 = vector.load %arg11[%c32, %c0_27] : memref<144x768xf32, #tpu.memory_space<vmem>>, vector<4x768xf32>
    tpu.vector_store %arg11[%c32, %c0_27], %22 {strides = array<i32>} : memref<144x768xf32, #tpu.memory_space<vmem>>, vector<4x768xf32>,
    %c0_28 = arith.constant 0 : index
    %c0_29 = arith.constant 0 : index
    %24 = vector.load %arg11[%c0_28, %c0_29] : memref<144x768xf32, #tpu.memory_space<vmem>>, vector<36x768xf32>
    %25 = arith.truncf %24 : vector<36x768xf32> to vector<36x768xbf16>
    %cst_30 = arith.constant dense<0.000000e+00> : vector<16x768xf32>
    %26 = tpu.matmul %4, %25, %cst_30 {dimension_numbers = #tpu.dot_dimension_numbers<[1], [0], [0], [1], [0, 0, 1, 1], [], []>} : vector<16x36xbf16>, vector<36x768xbf16>, vector<16x768xf32> -> vector<16x768xf32>
    %27 = vector.broadcast %0 : vector<1x768xf32> to vector<16x768xf32>
    %28 = arith.mulf %26, %27 : vector<16x768xf32>
    %cst_31 = arith.constant dense<0.000000e+00> : vector<16xf32>
    %29 = vector.multi_reduction <add>, %28, %cst_31 [1] : vector<16x768xf32> to vector<16xf32>
    %30 = vector.shape_cast %29 : vector<16xf32> to vector<16x1xf32>
    %31 = arith.mulf %26, %26 : vector<16x768xf32>
    %32 = vector.broadcast %0 : vector<1x768xf32> to vector<16x768xf32>
    %33 = arith.mulf %31, %32 : vector<16x768xf32>
    %cst_32 = arith.constant dense<0.000000e+00> : vector<16xf32>
    %34 = vector.multi_reduction <add>, %33, %cst_32 [1] : vector<16x768xf32> to vector<16xf32>
    %35 = vector.shape_cast %34 : vector<16xf32> to vector<16x1xf32>
    %cst_33 = arith.constant 0.001953125 : f32
    %36 = vector.broadcast %cst_33 : f32 to vector<16x1xf32>
    %37 = arith.mulf %30, %36 : vector<16x1xf32>
    %cst_34 = arith.constant 0.001953125 : f32
    %38 = vector.broadcast %cst_34 : f32 to vector<16x1xf32>
    %39 = arith.mulf %35, %38 : vector<16x1xf32>
    %40 = arith.mulf %37, %37 : vector<16x1xf32>
    %41 = arith.subf %39, %40 : vector<16x1xf32>
    %c0_35 = arith.constant 0 : index
    %c0_36 = arith.constant 0 : index
    %42 = vector.load %arg4[%c0_35, %c0_36] : memref<16x1xf32, #tpu.memory_space<vmem>>, vector<16x1xf32>
    %cst_37 = arith.constant 9.99999974E-6 : f32
    %43 = vector.broadcast %cst_37 : f32 to vector<16x1xf32>
    %44 = arith.addf %41, %43 : vector<16x1xf32>
    %45 = math.rsqrt %44 : vector<16x1xf32>
    %46 = arith.mulf %42, %45 : vector<16x1xf32>
    %c0_38 = arith.constant 0 : index
    %c0_39 = arith.constant 0 : index
    %47 = vector.load %arg5[%c0_38, %c0_39] : memref<16x1xf32, #tpu.memory_space<vmem>>, vector<16x1xf32>
    %48 = arith.mulf %37, %46 : vector<16x1xf32>
    %49 = arith.subf %47, %48 : vector<16x1xf32>
    %50 = vector.broadcast %46 : vector<16x1xf32> to vector<16x768xf32>
    %51 = arith.mulf %26, %50 : vector<16x768xf32>
    %52 = vector.broadcast %49 : vector<16x1xf32> to vector<16x768xf32>
    %53 = arith.addf %51, %52 : vector<16x768xf32>
    %cst_40 = arith.constant 0.000000e+00 : f32
    %54 = vector.broadcast %cst_40 : f32 to vector<16x768xf32>
    %55 = arith.cmpf oge, %53, %54 : vector<16x768xf32>
    %cst_41 = arith.constant 2.000000e-01 : f32
    %56 = vector.broadcast %cst_41 : f32 to vector<16x768xf32>
    %57 = arith.mulf %56, %53 : vector<16x768xf32>
    %58 = arith.select %55, %53, %57 : vector<16x768xi1>, vector<16x768xf32>
    %59 = vector.broadcast %0 : vector<1x768xf32> to vector<16x768xf32>
    %60 = arith.mulf %58, %59 : vector<16x768xf32>
    %c0_42 = arith.constant 0 : index
    %c0_43 = arith.constant 0 : index
    %61 = vector.load %arg3[%c0_42, %c0_43] : memref<16x144xbf16, #tpu.memory_space<vmem>>, vector<16x144xbf16>
    %c0_44 = arith.constant 0 : index
    %c128_45 = arith.constant 128 : index
    %62 = vector.load %arg10[%c0_44, %c128_45] : memref<16x1024xf32, #tpu.memory_space<vmem>>, vector<16x768xf32>
    tpu.vector_store %arg10[%c0_44, %c128_45], %60 {strides = array<i32>} : memref<16x1024xf32, #tpu.memory_space<vmem>>, vector<16x768xf32>,
    %c0_46 = arith.constant 0 : index
    %c109_47 = arith.constant 109 : index
    %63 = vector.load %arg10[%c0_46, %c109_47] : memref<16x1024xf32, #tpu.memory_space<vmem>>, vector<16x768xf32>
    %c0_48 = arith.constant 0 : index
    %c0_49 = arith.constant 0 : index
    %64 = vector.load %arg11[%c0_48, %c0_49] : memref<144x768xf32, #tpu.memory_space<vmem>>, vector<16x768xf32>
    tpu.vector_store %arg11[%c0_48, %c0_49], %63 {strides = array<i32>} : memref<144x768xf32, #tpu.memory_space<vmem>>, vector<16x768xf32>,
    %c0_50 = arith.constant 0 : index
    %c110_51 = arith.constant 110 : index
    %65 = vector.load %arg10[%c0_50, %c110_51] : memref<16x1024xf32, #tpu.memory_space<vmem>>, vector<16x768xf32>
    %c16_52 = arith.constant 16 : index
    %c0_53 = arith.constant 0 : index
    %66 = vector.load %arg11[%c16_52, %c0_53] : memref<144x768xf32, #tpu.memory_space<vmem>>, vector<16x768xf32>
    tpu.vector_store %arg11[%c16_52, %c0_53], %65 {strides = array<i32>} : memref<144x768xf32, #tpu.memory_space<vmem>>, vector<16x768xf32>,
    %c0_54 = arith.constant 0 : index
    %c111_55 = arith.constant 111 : index
    %67 = vector.load %arg10[%c0_54, %c111_55] : memref<16x1024xf32, #tpu.memory_space<vmem>>, vector<16x768xf32>
    %c32_56 = arith.constant 32 : index
    %c0_57 = arith.constant 0 : index
    %68 = vector.load %arg11[%c32_56, %c0_57] : memref<144x768xf32, #tpu.memory_space<vmem>>, vector<16x768xf32>
    tpu.vector_store %arg11[%c32_56, %c0_57], %67 {strides = array<i32>} : memref<144x768xf32, #tpu.memory_space<vmem>>, vector<16x768xf32>,
    %c0_58 = arith.constant 0 : index
    %c127_59 = arith.constant 127 : index
    %69 = vector.load %arg10[%c0_58, %c127_59] : memref<16x1024xf32, #tpu.memory_space<vmem>>, vector<16x768xf32>
    %c48 = arith.constant 48 : index
    %c0_60 = arith.constant 0 : index
    %70 = vector.load %arg11[%c48, %c0_60] : memref<144x768xf32, #tpu.memory_space<vmem>>, vector<16x768xf32>
    tpu.vector_store %arg11[%c48, %c0_60], %69 {strides = array<i32>} : memref<144x768xf32, #tpu.memory_space<vmem>>, vector<16x768xf32>,
    %c0_61 = arith.constant 0 : index
    %c128_62 = arith.constant 128 : index
    %71 = vector.load %arg10[%c0_61, %c128_62] : memref<16x1024xf32, #tpu.memory_space<vmem>>, vector<16x768xf32>
    %c64 = arith.constant 64 : index
    %c0_63 = arith.constant 0 : index
    %72 = vector.load %arg11[%c64, %c0_63] : memref<144x768xf32, #tpu.memory_space<vmem>>, vector<16x768xf32>
    tpu.vector_store %arg11[%c64, %c0_63], %71 {strides = array<i32>} : memref<144x768xf32, #tpu.memory_space<vmem>>, vector<16x768xf32>,
    %c0_64 = arith.constant 0 : index
    %c129_65 = arith.constant 129 : index
    %73 = vector.load %arg10[%c0_64, %c129_65] : memref<16x1024xf32, #tpu.memory_space<vmem>>, vector<16x768xf32>
    %c80 = arith.constant 80 : index
    %c0_66 = arith.constant 0 : index
    %74 = vector.load %arg11[%c80, %c0_66] : memref<144x768xf32, #tpu.memory_space<vmem>>, vector<16x768xf32>
    tpu.vector_store %arg11[%c80, %c0_66], %73 {strides = array<i32>} : memref<144x768xf32, #tpu.memory_space<vmem>>, vector<16x768xf32>,
    %c0_67 = arith.constant 0 : index
    %c145_68 = arith.constant 145 : index
    %75 = vector.load %arg10[%c0_67, %c145_68] : memref<16x1024xf32, #tpu.memory_space<vmem>>, vector<16x768xf32>
    %c96 = arith.constant 96 : index
    %c0_69 = arith.constant 0 : index
    %76 = vector.load %arg11[%c96, %c0_69] : memref<144x768xf32, #tpu.memory_space<vmem>>, vector<16x768xf32>
    tpu.vector_store %arg11[%c96, %c0_69], %75 {strides = array<i32>} : memref<144x768xf32, #tpu.memory_space<vmem>>, vector<16x768xf32>,
    %c0_70 = arith.constant 0 : index
    %c146_71 = arith.constant 146 : index
    %77 = vector.load %arg10[%c0_70, %c146_71] : memref<16x1024xf32, #tpu.memory_space<vmem>>, vector<16x768xf32>
    %c112 = arith.constant 112 : index
    %c0_72 = arith.constant 0 : index
    %78 = vector.load %arg11[%c112, %c0_72] : memref<144x768xf32, #tpu.memory_space<vmem>>, vector<16x768xf32>
    tpu.vector_store %arg11[%c112, %c0_72], %77 {strides = array<i32>} : memref<144x768xf32, #tpu.memory_space<vmem>>, vector<16x768xf32>,
    %c0_73 = arith.constant 0 : index
    %c147_74 = arith.constant 147 : index
    %79 = vector.load %arg10[%c0_73, %c147_74] : memref<16x1024xf32, #tpu.memory_space<vmem>>, vector<16x768xf32>
    %c128_75 = arith.constant 128 : index
    %c0_76 = arith.constant 0 : index
    %80 = vector.load %arg11[%c128_75, %c0_76] : memref<144x768xf32, #tpu.memory_space<vmem>>, vector<16x768xf32>
    tpu.vector_store %arg11[%c128_75, %c0_76], %79 {strides = array<i32>} : memref<144x768xf32, #tpu.memory_space<vmem>>, vector<16x768xf32>,
    %c0_77 = arith.constant 0 : index
    %c0_78 = arith.constant 0 : index
    %81 = vector.load %arg11[%c0_77, %c0_78] : memref<144x768xf32, #tpu.memory_space<vmem>>, vector<144x768xf32>
    %82 = arith.truncf %81 : vector<144x768xf32> to vector<144x768xbf16>
    %cst_79 = arith.constant dense<0.000000e+00> : vector<16x768xf32>
    %83 = tpu.matmul %61, %82, %cst_79 {dimension_numbers = #tpu.dot_dimension_numbers<[1], [0], [0], [1], [0, 0, 1, 1], [], []>} : vector<16x144xbf16>, vector<144x768xbf16>, vector<16x768xf32> -> vector<16x768xf32>
    %84 = vector.broadcast %0 : vector<1x768xf32> to vector<16x768xf32>
    %85 = arith.mulf %83, %84 : vector<16x768xf32>
    %cst_80 = arith.constant dense<0.000000e+00> : vector<16xf32>
    %86 = vector.multi_reduction <add>, %85, %cst_80 [1] : vector<16x768xf32> to vector<16xf32>
    %87 = vector.shape_cast %86 : vector<16xf32> to vector<16x1xf32>
    %88 = arith.mulf %83, %83 : vector<16x768xf32>
    %89 = vector.broadcast %0 : vector<1x768xf32> to vector<16x768xf32>
    %90 = arith.mulf %88, %89 : vector<16x768xf32>
    %cst_81 = arith.constant dense<0.000000e+00> : vector<16xf32>
    %91 = vector.multi_reduction <add>, %90, %cst_81 [1] : vector<16x768xf32> to vector<16xf32>
    %92 = vector.shape_cast %91 : vector<16xf32> to vector<16x1xf32>
    %cst_82 = arith.constant 0.001953125 : f32
    %93 = vector.broadcast %cst_82 : f32 to vector<16x1xf32>
    %94 = arith.mulf %87, %93 : vector<16x1xf32>
    %cst_83 = arith.constant 0.001953125 : f32
    %95 = vector.broadcast %cst_83 : f32 to vector<16x1xf32>
    %96 = arith.mulf %92, %95 : vector<16x1xf32>
    %97 = arith.mulf %94, %94 : vector<16x1xf32>
    %98 = arith.subf %96, %97 : vector<16x1xf32>
    %c0_84 = arith.constant 0 : index
    %c0_85 = arith.constant 0 : index
    %99 = vector.load %arg4[%c0_84, %c0_85] : memref<16x1xf32, #tpu.memory_space<vmem>>, vector<16x1xf32>
    %cst_86 = arith.constant 9.99999974E-6 : f32
    %100 = vector.broadcast %cst_86 : f32 to vector<16x1xf32>
    %101 = arith.addf %98, %100 : vector<16x1xf32>
    %102 = math.rsqrt %101 : vector<16x1xf32>
    %103 = arith.mulf %99, %102 : vector<16x1xf32>
    %c0_87 = arith.constant 0 : index
    %c0_88 = arith.constant 0 : index
    %104 = vector.load %arg5[%c0_87, %c0_88] : memref<16x1xf32, #tpu.memory_space<vmem>>, vector<16x1xf32>
    %105 = arith.mulf %94, %103 : vector<16x1xf32>
    %106 = arith.subf %104, %105 : vector<16x1xf32>
    %107 = vector.broadcast %103 : vector<16x1xf32> to vector<16x768xf32>
    %108 = arith.mulf %83, %107 : vector<16x768xf32>
    %109 = vector.broadcast %106 : vector<16x1xf32> to vector<16x768xf32>
    %110 = arith.addf %108, %109 : vector<16x768xf32>
    %cst_89 = arith.constant 0.000000e+00 : f32
    %111 = vector.broadcast %cst_89 : f32 to vector<16x768xf32>
    %112 = arith.cmpf oge, %110, %111 : vector<16x768xf32>
    %cst_90 = arith.constant 2.000000e-01 : f32
    %113 = vector.broadcast %cst_90 : f32 to vector<16x768xf32>
    %114 = arith.mulf %113, %110 : vector<16x768xf32>
    %115 = arith.select %112, %110, %114 : vector<16x768xi1>, vector<16x768xf32>
    %116 = vector.broadcast %0 : vector<1x768xf32> to vector<16x768xf32>
    %117 = arith.mulf %115, %116 : vector<16x768xf32>
    %118 = vector.extract_strided_slice %117 {offsets = [0, 0], sizes = [4, 768], strides = [1, 1]} : vector<16x768xf32> to vector<4x768xf32>
    %119 = vector.extract_strided_slice %117 {offsets = [4, 0], sizes = [4, 768], strides = [1, 1]} : vector<16x768xf32> to vector<4x768xf32>
    %120 = arith.maximumf %118, %119 : vector<4x768xf32>
    %121 = vector.extract_strided_slice %117 {offsets = [8, 0], sizes = [4, 768], strides = [1, 1]} : vector<16x768xf32> to vector<4x768xf32>
    %122 = arith.maximumf %120, %121 : vector<4x768xf32>
    %123 = vector.extract_strided_slice %117 {offsets = [12, 0], sizes = [4, 768], strides = [1, 1]} : vector<16x768xf32> to vector<4x768xf32>
    %124 = arith.maximumf %122, %123 : vector<4x768xf32>
    %125 = vector.broadcast %0 : vector<1x768xf32> to vector<4x768xf32>
    %126 = arith.mulf %124, %125 : vector<4x768xf32>
    %cst_91 = arith.constant dense<0.000000e+00> : vector<4xf32>
    %127 = vector.multi_reduction <add>, %126, %cst_91 [1] : vector<4x768xf32> to vector<4xf32>
    %128 = vector.shape_cast %127 : vector<4xf32> to vector<4x1xf32>
    %129 = arith.mulf %124, %124 : vector<4x768xf32>
    %130 = vector.broadcast %0 : vector<1x768xf32> to vector<4x768xf32>
    %131 = arith.mulf %129, %130 : vector<4x768xf32>
    %cst_92 = arith.constant dense<0.000000e+00> : vector<4xf32>
    %132 = vector.multi_reduction <add>, %131, %cst_92 [1] : vector<4x768xf32> to vector<4xf32>
    %133 = vector.shape_cast %132 : vector<4xf32> to vector<4x1xf32>
    %cst_93 = arith.constant 0.001953125 : f32
    %134 = vector.broadcast %cst_93 : f32 to vector<4x1xf32>
    %135 = arith.mulf %128, %134 : vector<4x1xf32>
    %cst_94 = arith.constant 0.001953125 : f32
    %136 = vector.broadcast %cst_94 : f32 to vector<4x1xf32>
    %137 = arith.mulf %133, %136 : vector<4x1xf32>
    %138 = arith.mulf %135, %135 : vector<4x1xf32>
    %139 = arith.subf %137, %138 : vector<4x1xf32>
    %c0_95 = arith.constant 0 : index
    %c0_96 = arith.constant 0 : index
    %140 = vector.load %arg6[%c0_95, %c0_96] : memref<4x1xf32, #tpu.memory_space<vmem>>, vector<4x1xf32>
    %cst_97 = arith.constant 9.99999974E-6 : f32
    %141 = vector.broadcast %cst_97 : f32 to vector<4x1xf32>
    %142 = arith.addf %139, %141 : vector<4x1xf32>
    %143 = math.rsqrt %142 : vector<4x1xf32>
    %144 = arith.mulf %140, %143 : vector<4x1xf32>
    %c0_98 = arith.constant 0 : index
    %c0_99 = arith.constant 0 : index
    %145 = vector.load %arg7[%c0_98, %c0_99] : memref<4x1xf32, #tpu.memory_space<vmem>>, vector<4x1xf32>
    %146 = arith.mulf %135, %144 : vector<4x1xf32>
    %147 = arith.subf %145, %146 : vector<4x1xf32>
    %148 = vector.broadcast %144 : vector<4x1xf32> to vector<4x768xf32>
    %149 = arith.mulf %124, %148 : vector<4x768xf32>
    %150 = vector.broadcast %147 : vector<4x1xf32> to vector<4x768xf32>
    %151 = arith.addf %149, %150 : vector<4x768xf32>
    %cst_100 = arith.constant 0.000000e+00 : f32
    %152 = vector.broadcast %cst_100 : f32 to vector<4x768xf32>
    %153 = arith.cmpf oge, %151, %152 : vector<4x768xf32>
    %cst_101 = arith.constant 2.000000e-01 : f32
    %154 = vector.broadcast %cst_101 : f32 to vector<4x768xf32>
    %155 = arith.mulf %154, %151 : vector<4x768xf32>
    %156 = arith.select %153, %151, %155 : vector<4x768xi1>, vector<4x768xf32>
    %157 = vector.broadcast %0 : vector<1x768xf32> to vector<4x768xf32>
    %158 = arith.mulf %156, %157 : vector<4x768xf32>
    %c0_102 = arith.constant 0 : index
    %c0_103 = arith.constant 0 : index
    %159 = vector.load %arg9[%c0_102, %c0_103] : memref<4x768xf32, #tpu.memory_space<vmem>>, vector<4x768xf32>
    tpu.vector_store %arg9[%c0_102, %c0_103], %158 {strides = array<i32>} : memref<4x768xf32, #tpu.memory_space<vmem>>, vector<4x768xf32>,
    return
  }
  func.func @transform_0(%arg0: i32) -> (i32, i32) {
    %c0_i32 = arith.constant 0 : i32
    %c0_i32_0 = arith.constant 0 : i32
    %c0_i32_1 = arith.constant 0 : i32
    return %c0_i32, %c0_i32_0 : i32, i32
  }
  func.func @transform_1(%arg0: i32) -> (i32, i32) {
    %c0_i32 = arith.constant 0 : i32
    %c0_i32_0 = arith.constant 0 : i32
    %c0_i32_1 = arith.constant 0 : i32
    return %c0_i32, %c0_i32_0 : i32, i32
  }
  func.func @transform_2(%arg0: i32) -> (i32, i32) {
    %c0_i32 = arith.constant 0 : i32
    %c0_i32_0 = arith.constant 0 : i32
    %c0_i32_1 = arith.constant 0 : i32
    return %c0_i32, %c0_i32_0 : i32, i32
  }
  func.func @transform_3(%arg0: i32) -> (i32, i32) {
    %c0_i32 = arith.constant 0 : i32
    %c0_i32_0 = arith.constant 0 : i32
    %c0_i32_1 = arith.constant 0 : i32
    return %c0_i32, %c0_i32_0 : i32, i32
  }
  func.func @transform_4(%arg0: i32) -> (i32, i32) {
    %c0_i32 = arith.constant 0 : i32
    %c0_i32_0 = arith.constant 0 : i32
    %c0_i32_1 = arith.constant 0 : i32
    return %c0_i32, %c0_i32_0 : i32, i32
  }
  func.func @transform_5(%arg0: i32) -> (i32, i32) {
    %c0_i32 = arith.constant 0 : i32
    %c0_i32_0 = arith.constant 0 : i32
    %c0_i32_1 = arith.constant 0 : i32
    return %c0_i32, %c0_i32_0 : i32, i32
  }
  func.func @transform_6(%arg0: i32) -> (i32, i32) {
    %c0_i32 = arith.constant 0 : i32
    %c0_i32_0 = arith.constant 0 : i32
    %c0_i32_1 = arith.constant 0 : i32
    return %c0_i32, %c0_i32_0 : i32, i32
  }
  func.func @transform_7(%arg0: i32) -> (i32, i32) {
    %c0_i32 = arith.constant 0 : i32
    %c0_i32_0 = arith.constant 0 : i32
    %c0_i32_1 = arith.constant 0 : i32
    return %c0_i32, %c0_i32_0 : i32, i32
  }
  func.func @transform_8(%arg0: i32) -> (i32, i32) {
    %c0_i32 = arith.constant 0 : i32
    %c0_i32_0 = arith.constant 0 : i32
    %c0_i32_1 = arith.constant 0 : i32
    return %c0_i32, %c0_i32_0 : i32, i32
  }
}

</mosaic_0001>

<bundles_post_ra>
// kernel: tpu_custom_call.1
= control target key start
LH: loop header
LB: loop body
LE: loop exit
PB: predicated region body
PF: predicated region fallthrough
CT: control target
= control target key end

     0   :  { %13 = vsyncpa [#allocation5], 0  ;;  %s3782_s0 = inlined_call_operand.vmem [shape: f32[4,768], index: 0, kind: input, shape index: {}]   ;;  %s3783_s1 = inlined_call_operand.vmem [shape: bf16[16,36], index: 1, kind: input, shape index: {}]   ;;  %s3784_s2 = inlined_call_operand.hbm [shape: bf16[16,144], index: 2, kind: input, shape index: {}]   ;;  %s3785_s3 = inlined_call_operand.vmem [shape: f32[16,1], index: 3, kind: input, shape index: {}]   ;;  %s3786_s4 = inlined_call_operand.vmem [shape: f32[16,1], index: 4, kind: input, shape index: {}]   ;;  %s3787_s5 = inlined_call_operand.vmem [shape: f32[4,1], index: 5, kind: input, shape index: {}]   ;;  %s3788_s6 = inlined_call_operand.vmem [shape: f32[4,1], index: 6, kind: input, shape index: {}]   ;;  %s3789_s7 = inlined_call_operand.vmem [shape: f32[1,768], index: 7, kind: input, shape index: {}]   ;;  %s3790_s8 = inlined_call_operand.hbm [shape: f32[4,768], index: 8, kind: output, shape index: {}]  }
   0x1   :  { %14 = vsyncpa [#allocation6], 0  ;;  %s23_s29 = sshll.u32 %s3784_s2, 4  ;;  %s2499_s30 = smov [#allocation4]   ;;  %s24_s29 = int_to_ptr.hbm [resolvable:$true] %s23_s29 }
   0x2   :  { %s25_s9 = sshll.u32 %s2499_s30, 4  ;;  %s2500_s10 = smov 128   ;;  %s26_s9 = int_to_ptr.vmem [resolvable:$true] %s25_s9 }
   0x3   :  { %s2501_s11 = smov 8  }
   0x4   :  { %31 = dma.hbm_to_vmem [thread:$0]  %s24_s29, 256, %s26_s9, [#allocation5], %s2500_s10, %s2500_s10, %s2501_s11  }
   0x5   :  { %2495 = dma.done.wait [#allocation5], 256  }
   0x6   :  { %2496 = vsyncadd [#allocation5], 4294967040  ;;  %v2502_v0 = vmov 0.0   ;;  %v64_v3 = vld [vmem:[%s3782_s0] sm:$0xff]  ;;  %s2503_s13 = smov 19   ;;  %v65_v5 = vld [vmem:[%s3782_s0 + $0x8] sm:$0xff] }
   0x7   :  { %48 = vst [vmem:[#allocation2 + $0x30] sm:$0xff] %v2502_v0  ;;  %s2504_s16 = smov 18   ;;  %s2505_s17 = smov 109   ;;  %v66_v18 = vld [vmem:[%s3782_s0 + $0x10] sm:$0xff]  ;;  %vm391_vm0 = vcmask 908288   ;;  %vm177_vm1 = vcmask 146432  }
   0x8   :  { %49 = vst [vmem:[#allocation2] sm:$0xff] %v2502_v0  ;;  %s2506_s18 = smov 111   ;;  %s2507_s19 = smov 127   ;;  %vm492_vm2 = vcmask 891904   ;;  %vm344_vm3 = vcmask 1039360   ;;  %vm123_vm4 = vcmask 154624  }
   0x9   :  { %50 = vst [vmem:[#allocation2 + $0x58] sm:$0xff] %v2502_v0  ;;  %s2508_s0 = smov 110   ;;  %s2509_s22 = smov 1   ;;  %vm445_vm5 = vcmask 900096   ;;  %vm568_vm6 = vcmask 1041408   ;;  %vm224_vm7 = vcmask 138240  }
   0xa   :  { %51 = vst [vmem:[#allocation2 + $0x18] sm:$0xff] %v2502_v0  ;;  %s2510_s23 = smov 17   ;;  %vm278_vm8 = vcmask 7168   ;;  %vm564_vm9 = vcmask 293888  }
   0xb   :  { %52 = vst [vmem:[#allocation2 + $0x50] sm:$0xff] %v2502_v0 }
   0xc   :  { %53 = vst [vmem:[#allocation2 + $0x68] sm:$0xff] %v2502_v0 }
   0xd   :  { %54 = vst [vmem:[#allocation2 + $0x8] sm:$0xff] %v2502_v0 }
   0xe   :  { %v95_v1 = vld [vmem:[#allocation2 + $0x30] sm:$0xf]  ;;  %55 = vst [vmem:[#allocation2 + $0x48] sm:$0xff] %v2502_v0 }
   0xf   :  { %v142_v2 = vld [vmem:[#allocation2 + $0x30] sm:$0xf]  ;;  %109 = vrot.lane.b32.xlu2 %v95_v1, %s2503_s13  ;;  %72 = vst [vmem:[#allocation1] ss:$2 sm:$0xff] %v64_v3 }
  0x10   :  { %v156_v4 = vrot.slane %v142_v2, 4  ;;  %74 = vst [vmem:[#allocation1 + $0x10] ss:$2 sm:$0xff] %v65_v5  ;;  %v243_v26 = vld [vmem:[#allocation2 + $0x30] sm:$0xf] }
  0x11   :  { %76 = vst [vmem:[#allocation1 + $0x20] ss:$2 sm:$0xff] %v66_v18  ;;  %v257_v28 = vrot.slane %v243_v26, 4  ;;  %v196_v30 = vld [vmem:[#allocation2 + $0x30] sm:$0xf] }
  0x12   :  { %163 = vrot.lane.b32.xlu1 %v156_v4, %s2504_s16 }
  0x15   :  { %v416_v18 = vld [vmem:[#allocation2 + $0x48] sm:$0xf] }
  0x16   :  { %v77_v6 = vld.sshfl [vmem:[#allocation1] sm:$0xff pattern:$0x75316420]  ;;  %v78_v7 = vld.sshfl [vmem:[#allocation1 + $0x8] sm:$0xff pattern:$0x75316420] }
  0x17   :  { %89 = vst [vmem:[#allocation2] sm:$0xf] %v77_v6  ;;  %v80_v8 = vld.sshfl [vmem:[#allocation1 + $0x18] sm:$0xff pattern:$0x75316420] }
  0x18   :  { %90 = vst [vmem:[#allocation2 + $0x58] sm:$0xf] %v78_v7  ;;  %v79_v9 = vld.sshfl [vmem:[#allocation1 + $0x10] sm:$0xff pattern:$0x75316420] }
  0x19   :  { %92 = vst [vmem:[#allocation2 + $0x50] sm:$0xf] %v80_v8  ;;  %v81_v24 = vld.sshfl [vmem:[#allocation1 + $0x20] sm:$0xff pattern:$0x75316420] }
  0x1a   :  { %91 = vst [vmem:[#allocation2 + $0x18] sm:$0xf] %v79_v9  ;;  %v82_v48 = vld.sshfl [vmem:[#allocation1 + $0x28] sm:$0xff pattern:$0x75316420] }
  0x1b   :  { %93 = vst [vmem:[#allocation2 + $0x68] sm:$0xf] %v81_v24  ;;  %v470_v8 = vld [vmem:[#allocation2 + $0x48] sm:$0xf] }
  0x1c   :  { %94 = vst [vmem:[#allocation2 + $0x8] sm:$0xf] %v82_v48  ;;  %v369_v24 = vld [vmem:[#allocation2 + $0x48] sm:$0xf] }
  0x1e   :  { %v464_v10 = vld [vmem:[#allocation2] sm:$0xf] }
  0x1f   :  { %v363_v11 = vld [vmem:[#allocation2] sm:$0xf]  ;;  %478 = vrot.lane.b32.xlu0 %v464_v10, %s2505_s17  ;;  %v310_v14 = vld [vmem:[#allocation2 + $0x58] sm:$0xf] }
  0x20   :  { %v309_v12 = vld [vmem:[#allocation2] sm:$0xf]  ;;  %377 = vrot.lane.b32.xlu2 %v363_v11, %s2506_s18  ;;  %v465_v15 = vld [vmem:[#allocation2 + $0x58] sm:$0xf]  ;;  %v324_v17 = vrot.slane %v310_v14, 4 }
  0x21   :  { %v323_v13 = vrot.slane %v309_v12, 4  ;;  %v364_v16 = vld [vmem:[#allocation2 + $0x58] sm:$0xf]  ;;  %v143_v19 = vld [vmem:[#allocation2] sm:$0xf] }
  0x22   :  { %v411_v20 = vld [vmem:[#allocation2 + $0x58] sm:$0xf]  ;;  %v157_v21 = vrot.slane %v143_v19, 4  ;;  %v96_v22 = vld [vmem:[#allocation2] sm:$0xf] }
  0x23   :  { %330 = vrot.lane.b32.xlu1 %v323_v13, %s2507_s19  ;;  %v425_v23 = vrot.slane %v411_v20, 4  ;;  %v410_v25 = vld [vmem:[#allocation2] sm:$0xf]  ;;  %v467_v31 = vld [vmem:[#allocation2 + $0x50] sm:$0xf] }
  0x24   :  { %v424_v27 = vrot.slane %v410_v25, 4  ;;  %v197_v29 = vld [vmem:[#allocation2] sm:$0xf]  ;;  %v466_v32 = vld [vmem:[#allocation2 + $0x18] sm:$0xf] }
  0x25   :  { %v244_v33 = vld [vmem:[#allocation2] sm:$0xf]  ;;  %v412_v34 = vld [vmem:[#allocation2 + $0x18] sm:$0xf]  ;;  %v312_v43 = vld [vmem:[#allocation2 + $0x50] sm:$0xf] }
  0x26   :  { %v258_v35 = vrot.slane %v244_v33, 4  ;;  %v426_v36 = vrot.slane %v412_v34, 4  ;;  %v365_v37 = vld [vmem:[#allocation2 + $0x18] sm:$0xf]  ;;  %v326_v45 = vrot.slane %v312_v43, 4 }
  0x27   :  { %480 = vrot.lane.b32.xlu0 %v465_v15, %s2505_s17  ;;  %v311_v38 = vld [vmem:[#allocation2 + $0x18] sm:$0xf]  ;;  %v468_v46 = vld [vmem:[#allocation2 + $0x68] sm:$0xf]  ;;  %v413_v50 = vld [vmem:[#allocation2 + $0x50] sm:$0xf] }
  0x28   :  { %379 = vrot.lane.b32.xlu2 %v364_v16, %s2506_s18  ;;  %v144_v39 = vld [vmem:[#allocation2 + $0x58] sm:$0xf]  ;;  %v325_v40 = vrot.slane %v311_v38, 4  ;;  %v313_v49 = vld [vmem:[#allocation2 + $0x68] sm:$0xf]  ;;  %v427_v53 = vrot.slane %v413_v50, 4 }
  0x29   :  { %v158_v41 = vrot.slane %v144_v39, 4  ;;  %v97_v42 = vld [vmem:[#allocation2 + $0x58] sm:$0xf]  ;;  %v327_v51 = vrot.slane %v313_v49, 4  ;;  %v414_v54 = vld [vmem:[#allocation2 + $0x68] sm:$0xf] }
  0x2a   :  { %v245_v44 = vld [vmem:[#allocation2 + $0x58] sm:$0xf]  ;;  %v366_v55 = vld [vmem:[#allocation2 + $0x50] sm:$0xf]  ;;  %v428_v57 = vrot.slane %v414_v54, 4 }
  0x2b   :  { %332 = vrot.lane.b32.xlu1 %v324_v17, %s2507_s19  ;;  %v259_v47 = vrot.slane %v245_v44, 4  ;;  %v198_v52 = vld [vmem:[#allocation2 + $0x58] sm:$0xf]  ;;  %v367_v60 = vld [vmem:[#allocation2 + $0x68] sm:$0xf] }
  0x2c   :  { %v98_v56 = vld [vmem:[#allocation2 + $0x18] sm:$0xf]  ;;  %v146_v1 = vld [vmem:[#allocation2 + $0x50] sm:$0xf]  ;;  %v469_v7 = vld [vmem:[#allocation2 + $0x8] sm:$0xf] }
  0x2d   :  { %v246_v58 = vld [vmem:[#allocation2 + $0x18] sm:$0xf]  ;;  %v160_v3 = vrot.slane %v146_v1, 4  ;;  %v99_v4 = vld [vmem:[#allocation2 + $0x50] sm:$0xf] }
  0x2e   :  { %v260_v59 = vrot.slane %v246_v58, 4  ;;  %v199_v61 = vld [vmem:[#allocation2 + $0x18] sm:$0xf]  ;;  %v247_v6 = vld [vmem:[#allocation2 + $0x50] sm:$0xf] }
  0x2f   :  { %111 = vrot.lane.b32.xlu0 %v96_v22, %s2503_s13  ;;  %v145_v63 = vld [vmem:[#allocation2 + $0x18] sm:$0xf]  ;;  %v297_v9 = vld [vmem:[#allocation2] sm:$0xf]  ;;  %v261_v10 = vrot.slane %v247_v6, 4 }
  0x30   :  { %165 = vrot.lane.b32.xlu2 %v157_v21, %s2504_s16  ;;  %v159_v2 = vrot.slane %v145_v63, 4  ;;  %303 = vst [vmem:[#allocation3 + $0xb8] sm:$0xf] %v297_v9  ;;  %v415_v11 = vld [vmem:[#allocation2 + $0x8] sm:$0xf] }
  0x31   :  { %v429_v14 = vrot.slane %v415_v11, 4  ;;  %v200_v15 = vld [vmem:[#allocation2 + $0x50] sm:$0xf]  ;;  %v368_v16 = vld [vmem:[#allocation2 + $0x8] sm:$0xf] }
  0x32   :  { %v314_v17 = vld [vmem:[#allocation2 + $0x8] sm:$0xf] }
  0x33   :  { %433 = vrot.lane.b32.xlu1 %v425_v23, %s2508_s0  ;;  %v328_v22 = vrot.slane %v314_v17, 4  ;;  %v430_v23 = vrot.slane %v416_v18, 4  ;;  %v315_v25 = vld [vmem:[#allocation2 + $0x48] sm:$0xf] }
  0x34   :  { %v148_v33 = vld [vmem:[#allocation2 + $0x8] sm:$0xf] }
  0x35   :  { %v162_v38 = vrot.slane %v148_v33, 4  ;;  %v249_v48 = vld [vmem:[#allocation2 + $0x8] sm:$0xf] }
  0x37   :  { %431 = vrot.lane.b32.xlu0 %v424_v27, %s2508_s0 }
  0x38   :  { %264 = vrot.lane.b32.xlu2 %v257_v28, %s2509_s22  ;;  %v147_v28 = vld [vmem:[#allocation2 + $0x68] sm:$0xf] }
  0x3b   :  { %212 = vrot.lane.b32.xlu1 %v197_v29, %s2510_s23 }
  0x3f   :  { %210 = vrot.lane.b32.xlu0 %v196_v30, %s2510_s23  ;;  %v329_v30 = vrot.slane %v315_v25, 4 }
  0x40   :  { %484 = vrot.lane.b32.xlu2 %v467_v31, %s2505_s17  ;;  %v201_v31 = vld [vmem:[#allocation2 + $0x68] sm:$0xf] }
  0x43   :  { %482 = vrot.lane.b32.xlu1 %v466_v32, %s2505_s17  ;;  %v161_v32 = vrot.slane %v147_v28, 4 }
  0x47   :  { %266 = vrot.lane.b32.xlu0 %v258_v35, %s2509_s22 }
  0x48   :  { %435 = vrot.lane.b32.xlu2 %v426_v36, %s2508_s0 }
  0x4b   :  { %381 = vrot.lane.b32.xlu1 %v365_v37, %s2506_s18 }
  0x4f   :  { %334 = vrot.lane.b32.xlu0 %v325_v40, %s2507_s19  ;;  %v100_v40 = vld [vmem:[#allocation2 + $0x68] sm:$0xf] }
  0x50   :  { %167 = vrot.lane.b32.xlu2 %v158_v41, %s2504_s16  ;;  %v101_v41 = vld [vmem:[#allocation2 + $0x8] sm:$0xf] }
  0x53   :  { %113 = vrot.lane.b32.xlu1 %v97_v42, %s2503_s13  ;;  %v248_v42 = vld [vmem:[#allocation2 + $0x68] sm:$0xf] }
  0x57   :  { %486 = vrot.lane.b32.xlu0 %v468_v46, %s2505_s17 }
  0x58   :  { %336 = vrot.lane.b32.xlu2 %v326_v45, %s2507_s19 }
  0x5b   :  { %268 = vrot.lane.b32.xlu1 %v259_v47, %s2509_s22  ;;  %v262_v47 = vrot.slane %v248_v42, 4 }
  0x5f   :  { %214 = vrot.lane.b32.xlu0 %v198_v52, %s2510_s23  ;;  %v299_v52 = vld [vmem:[#allocation2 + $0x18] sm:$0xf] }
  0x60   :  { %338 = vrot.lane.b32.xlu2 %v327_v51, %s2507_s19  ;;  %v298_v51 = vld [vmem:[#allocation2 + $0x58] sm:$0xf]  ;;  %305 = vst [vmem:[#allocation3 + $0x1f8] sm:$0xf] %v299_v52 }
  0x61   :  { %304 = vst [vmem:[#allocation3 + $0x138] sm:$0xf] %v298_v51 }
  0x63   :  { %437 = vrot.lane.b32.xlu1 %v427_v53, %s2508_s0 }
  0x67   :  { %383 = vrot.lane.b32.xlu0 %v366_v55, %s2506_s18  ;;  %v263_v55 = vrot.slane %v249_v48, 4 }
  0x68   :  { %115 = vrot.lane.b32.xlu2 %v98_v56, %s2503_s13 }
  0x69   :  { %v2612_v62 = vpop.permute.xlu2 %109 }
  0x6b   :  { %439 = vrot.lane.b32.xlu1 %v428_v57, %s2508_s0 }
  0x6f   :  { %385 = vrot.lane.b32.xlu0 %v367_v60, %s2506_s18 }
  0x70   :  { %270 = vrot.lane.b32.xlu2 %v260_v59, %s2509_s22 }
  0x73   :  { %216 = vrot.lane.b32.xlu1 %v199_v61, %s2510_s23  ;;  %v202_v61 = vld [vmem:[#allocation2 + $0x8] sm:$0xf] }
  0x77   :  { %169 = vrot.lane.b32.xlu0 %v159_v2, %s2504_s16 }
  0x78   :  { %171 = vrot.lane.b32.xlu2 %v160_v3, %s2504_s16 }
  0x7a   :  { %v378_v5 = vpop.permute.xlu2 %377 }
  0x7b   :  { %117 = vrot.lane.b32.xlu1 %v99_v4, %s2503_s13 }
  0x7f   :  { %488 = vrot.lane.b32.xlu0 %v469_v7, %s2505_s17 }
  0x80   :  { %490 = vrot.lane.b32.xlu2 %v470_v8, %s2505_s17 }
  0x82   :  { %v2621_v12 = vpop.permute.xlu2 %379 }
  0x83   :  { %272 = vrot.lane.b32.xlu1 %v261_v10, %s2509_s22  ;;  %v392_v13 = vsel %vm391_vm0, %v378_v5, %v2621_v12 }
  0x84   :  { %404 = vst [vmem:[#allocation3 + $0x358] sm:$0xf] %v392_v13  ;;  %v164_v20 = vpop.permute.xlu1 %163 }
  0x87   :  { %218 = vrot.lane.b32.xlu0 %v200_v15, %s2510_s23 }
  0x88   :  { %441 = vrot.lane.b32.xlu2 %v429_v14, %s2508_s0  ;;  %v300_v14 = vld [vmem:[#allocation2 + $0x50] sm:$0xf] }
  0x89   :  { %306 = vst [vmem:[#allocation3 + $0x78] sm:$0xf] %v300_v14 }
  0x8a   :  { %v2628_v19 = vpop.permute.xlu2 %165 }
  0x8b   :  { %387 = vrot.lane.b32.xlu1 %v368_v16, %s2506_s18  ;;  %v178_v21 = vsel %vm177_vm1, %v164_v20, %v2628_v19 }
  0x8c   :  { %190 = vst [vmem:[#allocation3 + $0x2a8] sm:$0xf0] %v178_v21 }
  0x8f   :  { %340 = vrot.lane.b32.xlu0 %v328_v22, %s2507_s19 }
  0x90   :  { %443 = vrot.lane.b32.xlu2 %v430_v23, %s2508_s0 }
  0x91   :  { %v479_v26 = vpop.permute.xlu0 %478 }
  0x92   :  { %v2635_v27 = vpop.permute.xlu2 %264 }
  0x93   :  { %389 = vrot.lane.b32.xlu1 %v369_v24, %s2506_s18 }
  0x95   :  { %v331_v29 = vpop.permute.xlu1 %330 }
  0x97   :  { %342 = vrot.lane.b32.xlu0 %v329_v30, %s2507_s19 }
  0x98   :  { %220 = vrot.lane.b32.xlu2 %v201_v31, %s2510_s23 }
  0x99   :  { %v481_v34 = vpop.permute.xlu0 %480 }
  0x9a   :  { %v2640_v35 = vpop.permute.xlu2 %484  ;;  %v493_v36 = vsel %vm492_vm2, %v479_v26, %v481_v34 }
  0x9b   :  { %173 = vrot.lane.b32.xlu1 %v161_v32, %s2504_s16  ;;  %505 = vst [vmem:[#allocation3 + $0x228] sm:$0xf] %v493_v36 }
  0x9d   :  { %v2643_v37 = vpop.permute.xlu1 %332 }
  0x9e   :  { %v345_v39 = vsel %vm344_vm3, %v331_v29, %v2643_v37 }
  0x9f   :  { %357 = vst [vmem:[#allocation3 + $0xb8] sm:$0xf0] %v345_v39  ;;  %119 = vrot.lane.b32.xlu0 %v100_v40, %s2503_s13 }
  0xa0   :  { %175 = vrot.lane.b32.xlu2 %v162_v38, %s2504_s16 }
  0xa1   :  { %v2649_v43 = vpop.permute.xlu0 %111 }
  0xa2   :  { %v2652_v44 = vpop.permute.xlu2 %435  ;;  %v124_v45 = vsel %vm123_vm4, %v2612_v62, %v2649_v43  ;;  %v535_v46 = vld [vmem:[#allocation3 + $0x228] sm:$0xf] }
  0xa3   :  { %121 = vrot.lane.b32.xlu1 %v101_v41, %s2503_s13  ;;  %136 = vst [vmem:[#allocation3 + $0x2a8] sm:$0xf] %v124_v45  ;;  %v553_v50 = vpack.c.bf16 %v535_v46, %v535_v46 }
  0xa5   :  { %v434_v49 = vpop.permute.xlu1 %433  ;;  %v570_v54 = vsel %vm568_vm6, %v553_v50, 0 }
  0xa6   :  { %v447_v53 = vsel %vm445_vm5, %v434_v49, %v2652_v44  ;;  %592 = vmatpush.bf16.msra.mxu3 %v570_v54  ;;  %v523_v2 = vld [vmem:[#allocation3 + $0xb8] sm:$0xff] }
  0xa7   :  { %459 = vst [vmem:[#allocation3 + $0x190] sm:$0xf0] %v447_v53  ;;  %274 = vrot.lane.b32.xlu0 %v262_v47, %s2509_s22 }
  0xa8   :  { %1120 = vrot.lane.b32.xlu2 %v2502_v0, %s2510_s23 }
  0xa9   :  { %v432_v56 = vpop.permute.xlu0 %431 }
  0xaa   :  { %v2664_v57 = vpop.permute.xlu2 %167  ;;  %v446_v58 = vsel %vm445_vm5, %v432_v56, %v434_v49  ;;  %v511_v25 = vld [vmem:[#allocation3 + $0x2a8] sm:$0xff] }
  0xab   :  { %276 = vrot.lane.b32.xlu1 %v263_v55, %s2509_s22  ;;  %v179_v59 = vsel %vm177_vm1, %v2628_v19, %v2664_v57  ;;  %458 = vst [vmem:[#allocation3 + $0x358] sm:$0xf0] %v446_v58 }
  0xac   :  { %191 = vst [vmem:[#allocation3 + $0x268] sm:$0xf0] %v179_v59  ;;  %v2753_v59 = vld [vmem:[%s3783_s1] sm:$0xff] }
  0xad   :  { %v2670_v60 = vpop.permute.xlu1 %212 }
  0xaf   :  { %222 = vrot.lane.b32.xlu0 %v202_v61, %s2510_s23 }
  0xb0   :  { %1510 = vrot.lane.b32.xlu2 %v2502_v0, %s2508_s0 }
  0xb1   :  { %v211_v62 = vpop.permute.xlu0 %210 }
  0xb2   :  { %v337_v63 = vpop.permute.xlu2 %336  ;;  %v225_v1 = vsel %vm224_vm7, %v211_v62, %v2670_v60  ;;  %v529_v3 = vld [vmem:[#allocation3 + $0x358] sm:$0xff] }
  0xb3   :  { %1198 = vrot.lane.b32.xlu1 %v2502_v0, %s2509_s22  ;;  %237 = vst [vmem:[#allocation3 + $0x130] sm:$0xf] %v225_v1  ;;  %v547_v5 = vpack.c.bf16 %v529_v3, %v523_v2  ;;  %v301_v2 = vld [vmem:[#allocation2 + $0x68] sm:$0xf] }
  0xb4   :  { %307 = vst [vmem:[#allocation3 + $0x338] sm:$0xf] %v301_v2 }
  0xb5   :  { %v483_v4 = vpop.permute.xlu1 %482  ;;  %593 = vmatpush.bf16.msra.mxu3 %v547_v5 }
  0xb6   :  { %v494_v6 = vsel %vm492_vm2, %v481_v34, %v483_v4  ;;  %v495_v7 = vsel %vm492_vm2, %v483_v4, %v2640_v35 }
  0xb7   :  { %506 = vst [vmem:[#allocation3 + $0x120] sm:$0xf] %v494_v6  ;;  %1212 = vrot.lane.b32.xlu0 %v2502_v0, %s2509_s22 }
  0xb8   :  { %507 = vst [vmem:[#allocation3 + $0x148] sm:$0xf] %v495_v7  ;;  %1432 = vrot.lane.b32.xlu2 %v2502_v0, %s2506_s18 }
  0xb9   :  { %v267_v8 = vpop.permute.xlu0 %266 }
  0xba   :  { %v2686_v9 = vpop.permute.xlu2 %338  ;;  %v279_v10 = vsel %vm278_vm8, %v2635_v27, %v267_v8 }
  0xbb   :  { %1014 = vrot.lane.b32.xlu1 %v2502_v0, %s2504_s16  ;;  %v348_v11 = vsel %vm344_vm3, %v337_v63, %v2686_v9  ;;  %291 = vst [vmem:[#allocation3 + $0x130] sm:$0xf0] %v279_v10 }
  0xbc   :  { %360 = vst [vmem:[#allocation3 + $0x78] sm:$0xf0] %v348_v11 }
  0xbd   :  { %v2694_v13 = vpop.permute.xlu1 %381 }
  0xbe   :  { %v393_v15 = vsel %vm391_vm0, %v2621_v12, %v2694_v13  ;;  %v536_v16 = vld [vmem:[#allocation3 + $0x120] sm:$0xf] }
  0xbf   :  { %405 = vst [vmem:[#allocation3 + $0x190] sm:$0xf] %v393_v15  ;;  %v554_v17 = vpack.c.bf16 %v536_v16, %v536_v16  ;;  %v537_v18 = vld [vmem:[#allocation3 + $0x148] sm:$0xf]  ;;  %1106 = vrot.lane.b32.xlu0 %v2502_v0, %s2510_s23 }
  0xc0   :  { %v555_v19 = vpack.c.bf16 %v537_v18, %v537_v18  ;;  %1340 = vrot.lane.b32.xlu2 %v2502_v0, %s2507_s19  ;;  %v302_v16 = vld [vmem:[#allocation2 + $0x8] sm:$0xf] }
  0xc1   :  { %v573_v20 = vsel %vm568_vm6, %v554_v17, 0  ;;  %v335_v22 = vpop.permute.xlu0 %334  ;;  %308 = vst [vmem:[#allocation3 + $0xd0] sm:$0xf] %v302_v16 }
  0xc2   :  { %606 = vmatpush.bf16.msra.mxu1 %v573_v20  ;;  %v576_v21 = vsel %vm568_vm6, %v555_v19, 0  ;;  %v2705_v23 = vpop.permute.xlu2 %115  ;;  %v346_v12 = vsel %vm344_vm3, %v2643_v37, %v335_v22  ;;  %v347_v24 = vsel %vm344_vm3, %v335_v22, %v337_v63  ;;  %v517_v26 = vld [vmem:[#allocation3 + $0x130] sm:$0xff] }
  0xc3   :  { %620 = vmatpush.bf16.msra.mxu2 %v576_v21  ;;  %922 = vrot.lane.b32.xlu1 %v2502_v0, %s2503_s13  ;;  %358 = vst [vmem:[#allocation3 + $0x138] sm:$0xf0] %v346_v12  ;;  %v541_v28 = vpack.c.bf16 %v517_v26, %v511_v25  ;;  %v526_v7 = vld [vmem:[#allocation3 + $0x78] sm:$0xff] }
  0xc4   :  { %359 = vst [vmem:[#allocation3 + $0x1f8] sm:$0xf0] %v347_v24 }
  0xc5   :  { %v114_v27 = vpop.permute.xlu1 %113  ;;  %594 = vmatpush.bf16.msra.mxu3 %v541_v28 }
  0xc6   :  { %v125_v29 = vsel %vm123_vm4, %v2649_v43, %v114_v27  ;;  %v126_v30 = vsel %vm123_vm4, %v114_v27, %v2705_v23  ;;  %v530_v36 = vld [vmem:[#allocation3 + $0x190] sm:$0xff] }
  0xc7   :  { %137 = vst [vmem:[#allocation3 + $0x268] sm:$0xf] %v125_v29  ;;  %1028 = vrot.lane.b32.xlu0 %v2502_v0, %s2504_s16 }
  0xc8   :  { %138 = vst [vmem:[#allocation3 + $0x310] sm:$0xf] %v126_v30  ;;  %1616 = vrot.lane.b32.xlu2 %v2502_v0, %s2505_s17  ;;  %2397 = vmatmul.msk.bf16.vlgmr.msra.gmra.mxu3 %vm564_vm9, %v2753_v59 }
  0xc9   :  { %v2720_v31 = vpop.permute.xlu0 %486 }
  0xca   :  { %v2722_v32 = vpop.permute.xlu2 %270  ;;  %v496_v33 = vsel %vm492_vm2, %v2640_v35, %v2720_v31  ;;  %v524_v34 = vld [vmem:[#allocation3 + $0x138] sm:$0xff] }
  0xcb   :  { %1418 = vrot.lane.b32.xlu1 %v2502_v0, %s2506_s18  ;;  %508 = vst [vmem:[#allocation3 + $0x158] sm:$0xf] %v496_v33  ;;  %v548_v38 = vpack.c.bf16 %v530_v36, %v524_v34  ;;  %v525_v61 = vld [vmem:[#allocation3 + $0x1f8] sm:$0xff] }
  0xcd   :  { %v269_v37 = vpop.permute.xlu1 %268  ;;  %607 = vmatpush.bf16.msra.mxu1 %v548_v38 }
  0xce   :  { %v280_v39 = vsel %vm278_vm8, %v267_v8, %v269_v37  ;;  %v281_v40 = vsel %vm278_vm8, %v269_v37, %v2722_v32  ;;  %v512_v52 = vld [vmem:[#allocation3 + $0x268] sm:$0xff] }
  0xcf   :  { %292 = vst [vmem:[#allocation3 + $0x140] sm:$0xf0] %v280_v39  ;;  %936 = vrot.lane.b32.xlu0 %v2502_v0, %s2503_s13 }
  0xd0   :  { %293 = vst [vmem:[#allocation3 + $0xf0] sm:$0xf0] %v281_v40 }
  0xd1   :  { %v215_v41 = vpop.permute.xlu0 %214 }
  0xd2   :  { %v2734_v42 = vpop.permute.xlu2 %171  ;;  %v226_v35 = vsel %vm224_vm7, %v2670_v60, %v215_v41  ;;  %v538_v43 = vld [vmem:[#allocation3 + $0x158] sm:$0xf] }
  0xd3   :  { %1326 = vrot.lane.b32.xlu1 %v2502_v0, %s2507_s19  ;;  %238 = vst [vmem:[#allocation3 + $0x140] sm:$0xf] %v226_v35  ;;  %v556_v46 = vpack.c.bf16 %v538_v43, %v538_v43 }
  0xd5   :  { %v438_v45 = vpop.permute.xlu1 %437  ;;  %v579_v48 = vsel %vm568_vm6, %v556_v46, 0 }
  0xd6   :  { %v448_v47 = vsel %vm445_vm5, %v2652_v44, %v438_v45  ;;  %634 = vmatpush.bf16.msrb.mxu3 %v579_v48 }
  0xd7   :  { %460 = vst [vmem:[#allocation3 + $0x320] sm:$0xf0] %v448_v47  ;;  %1524 = vrot.lane.b32.xlu0 %v2502_v0, %s2508_s0 }
  0xd9   :  { %v384_v49 = vpop.permute.xlu0 %383 }
  0xda   :  { %v491_v50 = vpop.permute.xlu2 %490  ;;  %v394_v51 = vsel %vm391_vm0, %v2694_v13, %v384_v49  ;;  %v518_v53 = vld [vmem:[#allocation3 + $0x140] sm:$0xff] }
  0xdb   :  { %1602 = vrot.lane.b32.xlu1 %v2502_v0, %s2505_s17  ;;  %406 = vst [vmem:[#allocation3 + $0x320] sm:$0xf] %v394_v51  ;;  %v542_v44 = vpack.c.bf16 %v518_v53, %v512_v52 }
  0xdd   :  { %v440_v54 = vpop.permute.xlu1 %439  ;;  %608 = vmatpush.bf16.msra.mxu1 %v542_v44 }
  0xde   :  { %v449_v55 = vsel %vm445_vm5, %v438_v45, %v440_v54 }
  0xdf   :  { %461 = vst [vmem:[#allocation3 + $0x208] sm:$0xf0] %v449_v55 }
  0xe0   :  { %2398 = vmatmul.msk.bf16.vlgmr.msra.gmra.mxu1 %vm564_vm9, %v2753_v59 }
  0xe1   :  { %v386_v56 = vpop.permute.xlu0 %385 }
  0xe2   :  { %v442_v58 = vpop.permute.xlu2 %441  ;;  %v395_v0 = vsel %vm391_vm0, %v384_v49, %v386_v56  ;;  %v531_v62 = vld [vmem:[#allocation3 + $0x320] sm:$0xff] }
  0xe3   :  { %v450_v60 = vsel %vm445_vm5, %v440_v54, %v442_v58  ;;  %407 = vst [vmem:[#allocation3 + $0x208] sm:$0xf] %v395_v0  ;;  %v549_v1 = vpack.c.bf16 %v531_v62, %v525_v61 }
  0xe4   :  { %462 = vst [vmem:[#allocation3 + $0x90] sm:$0xf0] %v450_v60 }
  0xe5   :  { %v217_v63 = vpop.permute.xlu1 %216  ;;  %621 = vmatpush.bf16.msra.mxu2 %v549_v1 }
  0xe6   :  { %v227_v3 = vsel %vm224_vm7, %v215_v41, %v217_v63 }
  0xe7   :  { %239 = vst [vmem:[#allocation3 + $0xf0] sm:$0xf] %v227_v3 }
  0xe9   :  { %v170_v4 = vpop.permute.xlu0 %169 }
  0xea   :  { %v180_v5 = vsel %vm177_vm1, %v2664_v57, %v170_v4  ;;  %v181_v6 = vsel %vm177_vm1, %v170_v4, %v2734_v42  ;;  %v532_v8 = vld [vmem:[#allocation3 + $0x208] sm:$0xff]  ;;  %v444_v10 = vpop.permute.xlu2 %443 }
  0xeb   :  { %192 = vst [vmem:[#allocation3 + $0x310] sm:$0xf0] %v180_v5  ;;  %v550_v13 = vpack.c.bf16 %v532_v8, %v526_v7  ;;  %v451_v14 = vsel %vm445_vm5, %v442_v58, %v444_v10 }
  0xec   :  { %193 = vst [vmem:[#allocation3 + $0x2c0] sm:$0xf0] %v181_v6 }
  0xed   :  { %v2766_v11 = vpop.permute.xlu1 %117  ;;  %635 = vmatpush.bf16.msrb.mxu3 %v550_v13  ;;  %463 = vst [vmem:[#allocation3 + $0x248] sm:$0xf0] %v451_v14 }
  0xee   :  { %v127_v15 = vsel %vm123_vm4, %v2705_v23, %v2766_v11  ;;  %v519_v20 = vld [vmem:[#allocation3 + $0xf0] sm:$0xff] }
  0xef   :  { %139 = vst [vmem:[#allocation3 + $0x2c0] sm:$0xf] %v127_v15 }
  0xf1   :  { %v489_v57 = vpop.permute.xlu0 %488 }
  0xf2   :  { %v497_v17 = vsel %vm492_vm2, %v2720_v31, %v489_v57  ;;  %v498_v18 = vsel %vm492_vm2, %v489_v57, %v491_v50  ;;  %v513_v19 = vld [vmem:[#allocation3 + $0x310] sm:$0xff]  ;;  %v221_v12 = vpop.permute.xlu2 %220 }
  0xf3   :  { %509 = vst [vmem:[#allocation3 + $0x2d0] sm:$0xf] %v497_v17  ;;  %v543_v22 = vpack.c.bf16 %v519_v20, %v513_v19 }
  0xf4   :  { %510 = vst [vmem:[#allocation3 + $0x198] sm:$0xf] %v498_v18 }
  0xf5   :  { %v273_v21 = vpop.permute.xlu1 %272  ;;  %622 = vmatpush.bf16.msra.mxu2 %v543_v22 }
  0xf6   :  { %v282_v23 = vsel %vm278_vm8, %v2722_v32, %v273_v21  ;;  %v514_v38 = vld [vmem:[#allocation3 + $0x2c0] sm:$0xff] }
  0xf7   :  { %294 = vst [vmem:[#allocation3 + $0x278] sm:$0xf0] %v282_v23 }
  0xf8   :  { %2399 = vmatmul.msk.bf16.vlgmr.msra.gmra.mxu2 %vm564_vm9, %v2753_v59 }
  0xf9   :  { %v219_v24 = vpop.permute.xlu0 %218 }
  0xfa   :  { %v228_v25 = vsel %vm224_vm7, %v217_v63, %v219_v24  ;;  %v229_v26 = vsel %vm224_vm7, %v219_v24, %v221_v12  ;;  %v539_v27 = vld [vmem:[#allocation3 + $0x2d0] sm:$0xf]  ;;  %v176_v45 = vpop.permute.xlu2 %175 }
  0xfb   :  { %240 = vst [vmem:[#allocation3 + $0x278] sm:$0xf] %v228_v25  ;;  %v557_v29 = vpack.c.bf16 %v539_v27, %v539_v27  ;;  %v540_v30 = vld [vmem:[#allocation3 + $0x198] sm:$0xf] }
  0xfc   :  { %241 = vst [vmem:[#allocation3 + $0x210] sm:$0xf] %v229_v26  ;;  %v558_v32 = vpack.c.bf16 %v540_v30, %v540_v30 }
  0xfd   :  { %v388_v28 = vpop.permute.xlu1 %387  ;;  %v582_v33 = vsel %vm568_vm6, %v557_v29, 0 }
  0xfe   :  { %v396_v31 = vsel %vm391_vm0, %v386_v56, %v388_v28  ;;  %648 = vmatpush.bf16.msra.mxu0 %v582_v33  ;;  %v585_v34 = vsel %vm568_vm6, %v558_v32, 0 }
  0xff   :  { %408 = vst [vmem:[#allocation3 + $0x90] sm:$0xf] %v396_v31  ;;  %662 = vmatpush.bf16.msrb.mxu1 %v585_v34 }
 0x101   :  { %v341_v36 = vpop.permute.xlu0 %340 }
 0x102   :  { %v349_v37 = vsel %vm344_vm3, %v2686_v9, %v341_v36  ;;  %v520_v39 = vld [vmem:[#allocation3 + $0x278] sm:$0xff] }
 0x103   :  { %361 = vst [vmem:[#allocation3 + $0x338] sm:$0xf0] %v349_v37  ;;  %v544_v41 = vpack.c.bf16 %v520_v39, %v514_v38 }
 0x105   :  { %v390_v40 = vpop.permute.xlu1 %389  ;;  %636 = vmatpush.bf16.msrb.mxu3 %v544_v41 }
 0x106   :  { %v397_v35 = vsel %vm391_vm0, %v388_v28, %v390_v40  ;;  %v533_v48 = vld [vmem:[#allocation3 + $0x90] sm:$0xff] }
 0x107   :  { %409 = vst [vmem:[#allocation3 + $0x248] sm:$0xf] %v397_v35 }
 0x108   :  { %2400 = vmatmul.msk.bf16.vlgmr.msrb.gmra.mxu3 %vm564_vm9, %v2753_v59 }
 0x109   :  { %v343_v43 = vpop.permute.xlu0 %342 }
 0x10a   :  { %v350_v46 = vsel %vm344_vm3, %v341_v36, %v343_v43  ;;  %v527_v47 = vld [vmem:[#allocation3 + $0x338] sm:$0xff] }
 0x10b   :  { %362 = vst [vmem:[#allocation3 + $0xd0] sm:$0xf0] %v350_v46  ;;  %v551_v49 = vpack.c.bf16 %v533_v48, %v527_v47 }
 0x10d   :  { %v174_v9 = vpop.permute.xlu1 %173  ;;  %649 = vmatpush.bf16.msra.mxu0 %v551_v49 }
 0x10e   :  { %v182_v50 = vsel %vm177_vm1, %v2734_v42, %v174_v9  ;;  %v183_v51 = vsel %vm177_vm1, %v174_v9, %v176_v45  ;;  %v534_v44 = vld [vmem:[#allocation3 + $0x248] sm:$0xff] }
 0x10f   :  { %194 = vst [vmem:[#allocation3 + $0x2c8] sm:$0xf0] %v182_v50 }
 0x110   :  { %195 = vst [vmem:[#allocation3 + $0x8] sm:$0xf0] %v183_v51 }
 0x111   :  { %v120_v52 = vpop.permute.xlu0 %119 }
 0x112   :  { %v128_v53 = vsel %vm123_vm4, %v2766_v11, %v120_v52  ;;  %v528_v54 = vld [vmem:[#allocation3 + $0xd0] sm:$0xff]  ;;  %v47_v11 = vld [vmem:[%s3789_s7] sm:$0x3f] }
 0x113   :  { %140 = vst [vmem:[#allocation3 + $0x2c8] sm:$0xf] %v128_v53  ;;  %v552_v56 = vpack.c.bf16 %v534_v44, %v528_v54  ;;  %v2812_v13 = vperm.slane %v47_v11, 0  ;;  %v2814_v14 = vperm.slane %v47_v11, 1  ;;  %v2826_v18 = vperm.slane %v47_v11, 2 }
 0x114   :  { %v2840_v26 = vperm.slane %v47_v11, 3  ;;  %v2851_v33 = vperm.slane %v47_v11, 4  ;;  %v2868_v47 = vperm.slane %v47_v11, 5 }
 0x115   :  { %v122_v55 = vpop.permute.xlu1 %121  ;;  %663 = vmatpush.bf16.msrb.mxu1 %v552_v56  ;;  %3813 = vst [vmem:[#allocation10_spill] sm:$0xff] %v2812_v13 }
 0x116   :  { %v129_v58 = vsel %vm123_vm4, %v120_v52, %v122_v55  ;;  %3814 = vst [vmem:[#allocation11_spill] sm:$0xff] %v2814_v14 }
 0x117   :  { %141 = vst [vmem:[#allocation3 + $0x8] sm:$0xf] %v129_v58 }
 0x118   :  { %3815 = vst [vmem:[#allocation12_spill] sm:$0xff] %v2826_v18 }
 0x119   :  { %v275_v0 = vpop.permute.xlu0 %274  ;;  %3816 = vst [vmem:[#allocation13_spill] sm:$0xff] %v2840_v26 }
 0x11a   :  { %v283_v42 = vsel %vm278_vm8, %v273_v21, %v275_v0  ;;  %v515_v1 = vld [vmem:[#allocation3 + $0x2c8] sm:$0xff]  ;;  %3817 = vst [vmem:[#allocation14_spill] sm:$0xff] %v2851_v33 }
 0x11b   :  { %295 = vst [vmem:[#allocation3 + $0x210] sm:$0xf0] %v283_v42 }
 0x11c   :  { %3818 = vst [vmem:[#allocation15_spill] sm:$0xff] %v2868_v47 }
 0x11d   :  { %v277_v60 = vpop.permute.xlu1 %276 }
 0x11e   :  { %v284_v61 = vsel %vm278_vm8, %v275_v0, %v277_v60  ;;  %v516_v4 = vld [vmem:[#allocation3 + $0x8] sm:$0xff] }
 0x11f   :  { %296 = vst [vmem:[#allocation3 + $0x2e8] sm:$0xf0] %v284_v61 }
 0x121   :  { %v223_v62 = vpop.permute.xlu0 %222 }
 0x122   :  { %v230_v63 = vsel %vm224_vm7, %v221_v12, %v223_v62  ;;  %v521_v2 = vld [vmem:[#allocation3 + $0x210] sm:$0xff] }
 0x123   :  { %242 = vst [vmem:[#allocation3 + $0x2e8] sm:$0xf] %v230_v63  ;;  %v545_v3 = vpack.c.bf16 %v521_v2, %v515_v1 }
 0x125   :  { %650 = vmatpush.bf16.msra.mxu0 %v545_v3 }
 0x128   :  { %2401 = vmatmul.msk.bf16.vlgmr.msra.gmra.mxu0 %vm564_vm9, %v2753_v59 }
 0x12a   :  { %v522_v5 = vld [vmem:[#allocation3 + $0x2e8] sm:$0xff] }
 0x12b   :  { %v546_v6 = vpack.c.bf16 %v522_v5, %v516_v4 }
 0x12d   :  { %664 = vmatpush.bf16.msrb.mxu1 %v546_v6 }
 0x130   :  { %2402 = vmatmul.msk.bf16.vlgmr.msrb.gmra.mxu1 %vm564_vm9, %v2753_v59 }
 0x14b   :  { %v2803_v7 = vpop.f32.mrf.mxu3 }
 0x14c   :  { %v710_v16 = vmul.f32 %v2803_v7, %v2803_v7  ;;  %v684_v57 = vmul.f32 %v2812_v13, %v2803_v7 }
 0x14e   :  { %v722_v19 = vmul.f32 %v710_v16, %v2812_v13 }
 0x153   :  { %v2805_v8 = vpop.f32.mrf.mxu3 }
 0x154   :  { %v716_v12 = vmul.f32 %v2805_v8, %v2805_v8  ;;  %v690_v34 = vmul.f32 %v2812_v13, %v2805_v8 }
 0x156   :  { %v728_v37 = vmul.f32 %v716_v12, %v2812_v13 }
 0x15d   :  { %v2807_v10 = vpop.f32.mrf.mxu1 }
 0x15e   :  { %v711_v59 = vmul.f32 %v2807_v10, %v2807_v10  ;;  %v685_v17 = vmul.f32 %v2814_v14, %v2807_v10 }
 0x160   :  { %v723_v20 = vmul.f32 %v711_v59, %v2814_v14  ;;  %v696_v24 = vadd.f32 %v685_v17, %v684_v57 }
 0x162   :  { %v734_v27 = vadd.f32 %v723_v20, %v722_v19 }
 0x165   :  { %v2834_v23 = vpop.f32.mrf.mxu1 }
 0x166   :  { %v717_v30 = vmul.f32 %v2834_v23, %v2834_v23  ;;  %v691_v36 = vmul.f32 %v2814_v14, %v2834_v23 }
 0x168   :  { %v729_v35 = vmul.f32 %v717_v30, %v2814_v14  ;;  %v703_v48 = vadd.f32 %v691_v36, %v690_v34  ;;  %v2908_v30 = vpop.permute.xlu0 %1212 }
 0x16a   :  { %v741_v52 = vadd.f32 %v729_v35, %v728_v37 }
 0x170   :  { %v2914_v37 = vpop.permute.xlu0 %1106 }
 0x17b   :  { %v2816_v15 = vpop.f32.mrf.mxu2 }
 0x17c   :  { %v712_v21 = vmul.f32 %v2816_v15, %v2816_v15  ;;  %v686_v25 = vmul.f32 %v2826_v18, %v2816_v15 }
 0x17e   :  { %v724_v28 = vmul.f32 %v712_v21, %v2826_v18  ;;  %v697_v38 = vadd.f32 %v696_v24, %v686_v25 }
 0x180   :  { %v735_v45 = vadd.f32 %v734_v27, %v724_v28  ;;  %v2902_v27 = vpop.permute.xlu1 %1198  ;;  %v2904_v28 = vpop.permute.xlu2 %1120 }
 0x183   :  { %v2849_v32 = vpop.f32.mrf.mxu2 }
 0x184   :  { %v718_v43 = vmul.f32 %v2849_v32, %v2849_v32  ;;  %v692_v9 = vmul.f32 %v2826_v18, %v2849_v32 }
 0x186   :  { %v730_v53 = vmul.f32 %v718_v43, %v2826_v18  ;;  %v704_v60 = vadd.f32 %v703_v48, %v692_v9  ;;  %v2511_v48 = vmov 0  }
 0x187   :  { %2434 = vset.pattern.permute.xlu2 %v2511_v48  ;;  %2435 = vset.pattern.permute.xlu1 %v2511_v48 }
 0x188   :  { %v742_v6 = vadd.f32 %v741_v52, %v730_v53  ;;  %v2910_v34 = vpop.permute.xlu2 %1510  ;;  %2436 = vset.pattern.permute.xlu0 %v2511_v48 }
 0x18b   :  { %v2832_v22 = vpop.f32.mrf.mxu3 }
 0x18c   :  { %v713_v29 = vmul.f32 %v2832_v22, %v2832_v22  ;;  %v687_v39 = vmul.f32 %v2840_v26, %v2832_v22 }
 0x18e   :  { %v725_v41 = vmul.f32 %v713_v29, %v2840_v26  ;;  %v698_v50 = vadd.f32 %v697_v38, %v687_v39  ;;  %v2906_v29 = vpop.permute.xlu1 %1014 }
 0x190   :  { %v736_v55 = vadd.f32 %v735_v45, %v725_v41  ;;  %v2916_v38 = vpop.permute.xlu2 %1432 }
 0x193   :  { %v2872_v49 = vpop.f32.mrf.mxu3 }
 0x194   :  { %v719_v56 = vmul.f32 %v2872_v49, %v2872_v49  ;;  %v693_v61 = vmul.f32 %v2840_v26, %v2872_v49 }
 0x196   :  { %v731_v3 = vmul.f32 %v719_v56, %v2840_v26  ;;  %v705_v11 = vadd.f32 %v704_v60, %v693_v61  ;;  %v2912_v36 = vpop.permute.xlu1 %922 }
 0x198   :  { %v743_v20 = vadd.f32 %v742_v6, %v731_v3  ;;  %v2922_v41 = vpop.permute.xlu2 %1340 }
 0x19e   :  { %v2918_v39 = vpop.permute.xlu1 %1418 }
 0x1a0   :  { %v2928_v45 = vpop.permute.xlu2 %1616 }
 0x1a1   :  { %3819 = vst [vmem:[#allocation16_spill] sm:$0xff] %v2928_v45 }
 0x1a5   :  { %v2847_v31 = vpop.f32.mrf.mxu0 }
 0x1a6   :  { %v714_v40 = vmul.f32 %v2847_v31, %v2847_v31  ;;  %v688_v46 = vmul.f32 %v2851_v33, %v2847_v31  ;;  %v2924_v35 = vpop.permute.xlu1 %1326 }
 0x1a8   :  { %v726_v51 = vmul.f32 %v714_v40, %v2851_v33  ;;  %v699_v42 = vadd.f32 %v698_v50, %v688_v46  ;;  %v2920_v40 = vpop.permute.xlu0 %1028 }
 0x1aa   :  { %v737_v2 = vadd.f32 %v736_v55, %v726_v51 }
 0x1ad   :  { %v2876_v54 = vpop.f32.mrf.mxu0  ;;  %v2878_v44 = vpop.f32.mrf.mxu1 }
 0x1ae   :  { %v715_v58 = vmul.f32 %v2878_v44, %v2878_v44  ;;  %v689_v0 = vmul.f32 %v2868_v47, %v2878_v44  ;;  %v720_v62 = vmul.f32 %v2876_v54, %v2876_v54  ;;  %v694_v4 = vmul.f32 %v2851_v33, %v2876_v54  ;;  %v2930_v46 = vpop.permute.xlu1 %1602 }
 0x1b0   :  { %v700_v63 = vadd.f32 %v699_v42, %v689_v0  ;;  %v727_v1 = vmul.f32 %v715_v58, %v2868_v47  ;;  %v732_v16 = vmul.f32 %v720_v62, %v2851_v33  ;;  %v706_v19 = vadd.f32 %v705_v11, %v694_v4  ;;  %v2926_v43 = vpop.permute.xlu0 %936 }
 0x1b2   :  { %701 = vadd.xlane.f32.xlu2 %v700_v63  ;;  %v738_v5 = vadd.f32 %v737_v2, %v727_v1  ;;  %v744_v24 = vadd.f32 %v743_v20, %v732_v16 }
 0x1b4   :  { %739 = vadd.xlane.f32.xlu1 %v738_v5 }
 0x1b5   :  { %v2895_v59 = vpop.f32.mrf.mxu1 }
 0x1b6   :  { %v721_v57 = vmul.f32 %v2895_v59, %v2895_v59  ;;  %v695_v17 = vmul.f32 %v2868_v47, %v2895_v59 }
 0x1b8   :  { %v707_v21 = vadd.f32 %v706_v19, %v695_v17  ;;  %v733_v12 = vmul.f32 %v721_v57, %v2868_v47  ;;  %v2932_v9 = vpop.permute.xlu0 %1524  ;;  %v756_v57 = vld [vmem:[%s3785_s3] sm:$0xff] }
 0x1ba   :  { %708 = vadd.xlane.f32.xlu0 %v707_v21  ;;  %v745_v25 = vadd.f32 %v744_v24, %v733_v12  ;;  %v782_v24 = vld [vmem:[%s3786_s4] sm:$0xff] }
 0x1bc   :  { %746 = vadd.xlane.f32.xlu2 %v745_v25 }
 0x225   :  { %v702_v50 = vpop.xlane.xlu2 %701 }
 0x226   :  { %v748_v51 = vmul.f32 0.001953125, %v702_v50 }
 0x227   :  { %v740_v52 = vpop.xlane.xlu1 %739 }
 0x228   :  { %v752_v53 = vmul.f32 %v748_v51, %v748_v51  ;;  %v750_v55 = vmul.f32 0.001953125, %v740_v52  ;;  %v757_v52 = vld [vmem:[%s3785_s3 + $0x8] sm:$0xff] }
 0x22a   :  { %v754_v56 = vsub.f32 %v750_v55, %v752_v53 }
 0x22c   :  { %v758_v58 = vadd.f32 1e-05, %v754_v56 }
 0x22d   :  { %v709_v0 = vpop.xlane.xlu0 %708 }
 0x22e   :  { %2437 = vrsqrt.f32 %v758_v58  ;;  %v749_v42 = vmul.f32 0.001953125, %v709_v0  ;;  %vm766_vm11 = vweird.f32 %v758_v58 }
 0x22f   :  { %v747_v60 = vpop.xlane.xlu2 %746 }
 0x230   :  { %v753_v61 = vmul.f32 %v749_v42, %v749_v42  ;;  %v751_v62 = vmul.f32 0.001953125, %v747_v60 }
 0x232   :  { %v755_v63 = vsub.f32 %v751_v62, %v753_v61 }
 0x234   :  { %v2438_v1 = vpop.eup %2437  ;;  %v759_v2 = vadd.f32 1e-05, %v755_v63 }
 0x235   :  { %v761_v3 = vmul.f32 %v2438_v1, %v758_v58  ;;  %vm767_vm10 = vweird.f32 %v2438_v1  ;;  %v783_v58 = vld [vmem:[%s3786_s4 + $0x8] sm:$0xff] }
 0x236   :  { %2439 = vrsqrt.f32 %v759_v2  ;;  %vm768_vm12 = vmor %vm766_vm11, %vm767_vm10  ;;  %vm776_vm14 = vweird.f32 %v759_v2 }
 0x237   :  { %v762_v4 = vmul.f32 %v2438_v1, %v761_v3 }
 0x239   :  { %v763_v5 = vmul.f32 0.5, %v762_v4 }
 0x23b   :  { %v764_v6 = vsub.f32 1.5, %v763_v5 }
 0x23c   :  { %v2440_v11 = vpop.eup %2439 }
 0x23d   :  { %v771_v16 = vmul.f32 %v2440_v11, %v759_v2  ;;  %v765_v17 = vmul.f32 %v2438_v1, %v764_v6  ;;  %vm777_vm13 = vweird.f32 %v2440_v11 }
 0x23e   :  { %vm778_vm15 = vmor %vm776_vm14, %vm777_vm13 }
 0x23f   :  { %v772_v19 = vmul.f32 %v2440_v11, %v771_v16  ;;  %v769_v20 = vsel %vm768_vm12, %v2438_v1, %v765_v17 }
 0x240   :  { %v780_v21 = vmul.f32 %v769_v20, %v756_v57 }
 0x241   :  { %v773_v12 = vmul.f32 0.5, %v772_v19 }
 0x242   :  { %790 = vperm.xlu2 %2434, %v780_v21   ;;  %v784_v25 = vmul.f32 %v780_v21, %v748_v51 }
 0x243   :  { %v774_v48 = vsub.f32 1.5, %v773_v12 }
 0x244   :  { %v786_v50 = vsub.f32 %v782_v24, %v784_v25 }
 0x245   :  { %v775_v53 = vmul.f32 %v2440_v11, %v774_v48 }
 0x246   :  { %812 = vperm.xlu1 %2435, %v786_v50  }
 0x247   :  { %v779_v55 = vsel %vm778_vm15, %v2440_v11, %v775_v53 }
 0x248   :  { %v781_v56 = vmul.f32 %v779_v55, %v757_v52 }
 0x24a   :  { %795 = vperm.xlu0 %2436, %v781_v56   ;;  %v785_v0 = vmul.f32 %v781_v56, %v749_v42 }
 0x24c   :  { %v787_v51 = vsub.f32 %v783_v58, %v785_v0 }
 0x24e   :  { %817 = vperm.xlu2 %2434, %v787_v51  }
 0x29c   :  { %v791_v60 = vpop.permute.xlu2 %790 }
 0x29d   :  { %v798_v61 = vmul.f32 %v791_v60, %v2803_v7  ;;  %v799_v62 = vmul.f32 %v791_v60, %v2807_v10  ;;  %v800_v63 = vmul.f32 %v791_v60, %v2816_v15  ;;  %v801_v1 = vmul.f32 %v791_v60, %v2832_v22 }
 0x29e   :  { %v802_v2 = vmul.f32 %v791_v60, %v2847_v31  ;;  %v803_v3 = vmul.f32 %v791_v60, %v2878_v44 }
 0x2a8   :  { %v818_v56 = vpop.permute.xlu2 %817 }
 0x2b8   :  { %v813_v4 = vpop.permute.xlu1 %812 }
 0x2b9   :  { %v820_v5 = vadd.f32 %v813_v4, %v798_v61  ;;  %v821_v6 = vadd.f32 %v813_v4, %v799_v62  ;;  %v822_v11 = vadd.f32 %v813_v4, %v800_v63  ;;  %v823_v42 = vadd.f32 %v813_v4, %v801_v1 }
 0x2ba   :  { %v824_v16 = vadd.f32 %v813_v4, %v802_v2  ;;  %v825_v57 = vadd.f32 %v813_v4, %v803_v3 }
 0x2bb   :  { %vm832_vm6 = vcmp.ge.f32.partialorder %v820_v5, 0.0  ;;  %vm833_vm9 = vcmp.ge.f32.partialorder %v821_v6, 0.0  ;;  %vm834_vm10 = vcmp.ge.f32.partialorder %v822_v11, 0.0  ;;  %vm835_vm11 = vcmp.ge.f32.partialorder %v823_v42, 0.0 }
 0x2bc   :  { %vm836_vm12 = vcmp.ge.f32.partialorder %v824_v16, 0.0  ;;  %vm837_vm13 = vcmp.ge.f32.partialorder %v825_v57, 0.0  ;;  %v844_v7 = vmul.f32 0.2, %v820_v5  ;;  %v845_v10 = vmul.f32 0.2, %v821_v6  ;;  %v796_v15 = vpop.permute.xlu0 %795 }
 0x2bd   :  { %v846_v22 = vmul.f32 0.2, %v822_v11  ;;  %v847_v31 = vmul.f32 0.2, %v823_v42  ;;  %v848_v17 = vmul.f32 0.2, %v824_v16  ;;  %v804_v44 = vmul.f32 %v796_v15, %v2805_v8 }
 0x2be   :  { %v849_v19 = vmul.f32 0.2, %v825_v57  ;;  %v856_v20 = vsel %vm832_vm6, %v820_v5, %v844_v7  ;;  %v857_v21 = vsel %vm833_vm9, %v821_v6, %v845_v10  ;;  %v805_v12 = vmul.f32 %v796_v15, %v2834_v23 }
 0x2bf   :  { %v858_v24 = vsel %vm834_vm10, %v822_v11, %v846_v22  ;;  %v859_v25 = vsel %vm835_vm11, %v823_v42, %v847_v31  ;;  %v860_v48 = vsel %vm836_vm12, %v824_v16, %v848_v17  ;;  %v2955_v50 = vmul.f32 %v856_v20, %v2812_v13 }
 0x2c0   :  { %v861_v52 = vsel %vm837_vm13, %v825_v57, %v849_v19  ;;  %v2959_v53 = vmul.f32 %v857_v21, %v2814_v14  ;;  %v2962_v55 = vmul.f32 %v858_v24, %v2826_v18  ;;  %v2965_v8 = vmul.f32 %v859_v25, %v2840_v26 }
 0x2c1   :  { %v2968_v23 = vmul.f32 %v860_v48, %v2851_v33  ;;  %v2971_v58 = vmul.f32 %v861_v52, %v2868_v47  ;;  %882 = vst [vmem:[#allocation2] sm:$0xff] %v2955_v50  ;;  %v806_v0 = vmul.f32 %v796_v15, %v2849_v32  ;;  %v807_v51 = vmul.f32 %v796_v15, %v2872_v49 }
 0x2c2   :  { %883 = vst [vmem:[#allocation2 + $0x58] sm:$0xff] %v2959_v53  ;;  %v808_v60 = vmul.f32 %v796_v15, %v2876_v54  ;;  %v809_v61 = vmul.f32 %v796_v15, %v2895_v59  ;;  %v826_v62 = vadd.f32 %v818_v56, %v804_v44  ;;  %v827_v63 = vadd.f32 %v818_v56, %v805_v12 }
 0x2c3   :  { %884 = vst [vmem:[#allocation2 + $0x18] sm:$0xff] %v2962_v55  ;;  %v828_v1 = vadd.f32 %v818_v56, %v806_v0  ;;  %v829_v2 = vadd.f32 %v818_v56, %v807_v51  ;;  %1500 = vrot.lane.b32.xlu2 %v2959_v53, %s2508_s0  ;;  %1498 = vrot.lane.b32.xlu1 %v2955_v50, %s2508_s0  ;;  %vm1825_vm12 = vcmask 130048  }
 0x2c4   :  { %885 = vst [vmem:[#allocation2 + $0x50] sm:$0xff] %v2965_v8  ;;  %v830_v32 = vadd.f32 %v818_v56, %v808_v60  ;;  %v831_v49 = vadd.f32 %v818_v56, %v809_v61  ;;  %vm838_vm14 = vcmp.ge.f32.partialorder %v826_v62, 0.0  ;;  %1406 = vrot.lane.b32.xlu0 %v2955_v50, %s2506_s18  ;;  %vm839_vm15 = vcmp.ge.f32.partialorder %v827_v63, 0.0 }
 0x2c5   :  { %886 = vst [vmem:[#allocation2 + $0x68] sm:$0xff] %v2968_v23  ;;  %vm840_vm6 = vcmp.ge.f32.partialorder %v828_v1, 0.0  ;;  %v850_v54 = vmul.f32 0.2, %v826_v62  ;;  %vm841_vm9 = vcmp.ge.f32.partialorder %v829_v2, 0.0 }
 0x2c6   :  { %887 = vst [vmem:[#allocation2 + $0x8] sm:$0xff] %v2971_v58  ;;  %vm842_vm10 = vcmp.ge.f32.partialorder %v830_v32, 0.0  ;;  %vm843_vm11 = vcmp.ge.f32.partialorder %v831_v49, 0.0  ;;  %v851_v59 = vmul.f32 0.2, %v827_v63 }
 0x2c7   :  { %v852_v3 = vmul.f32 0.2, %v828_v1  ;;  %v853_v4 = vmul.f32 0.2, %v829_v2  ;;  %v854_v5 = vmul.f32 0.2, %v830_v32  ;;  %v862_v6 = vsel %vm838_vm14, %v826_v62, %v850_v54 }
 0x2c8   :  { %v855_v11 = vmul.f32 0.2, %v831_v49  ;;  %v863_v42 = vsel %vm839_vm15, %v827_v63, %v851_v59  ;;  %v2990_v16 = vmul.f32 %v862_v6, %v2812_v13 }
 0x2c9   :  { %v864_v57 = vsel %vm840_vm6, %v828_v1, %v852_v3  ;;  %v865_v7 = vsel %vm841_vm9, %v829_v2, %v853_v4  ;;  %v866_v10 = vsel %vm842_vm10, %v830_v32, %v854_v5  ;;  %v2993_v15 = vmul.f32 %v863_v42, %v2814_v14 }
 0x2ca   :  { %v867_v22 = vsel %vm843_vm11, %v831_v49, %v855_v11  ;;  %v2996_v31 = vmul.f32 %v864_v57, %v2826_v18  ;;  %v2999_v17 = vmul.f32 %v865_v7, %v2840_v26  ;;  %v3002_v44 = vmul.f32 %v866_v10, %v2851_v33  ;;  %v3017_v20 = vld [vmem:[#allocation2 + $0x18] sm:$0xff] }
 0x2cb   :  { %v3005_v19 = vmul.f32 %v867_v22, %v2868_v47  ;;  %1504 = vrot.lane.b32.xlu2 %v2965_v8, %s2508_s0  ;;  %1408 = vrot.lane.b32.xlu1 %v2959_v53, %s2506_s18  ;;  %v3019_v21 = vld [vmem:[#allocation2 + $0x50] sm:$0xff] }
 0x2cc   :  { %890 = vst [vmem:[#allocation2 + $0x38] sm:$0xff] %v2996_v31  ;;  %1314 = vrot.lane.b32.xlu0 %v2955_v50, %s2507_s19  ;;  %v3027_v24 = vld [vmem:[#allocation2 + $0x68] sm:$0xff] }
 0x2cd   :  { %891 = vst [vmem:[#allocation2 + $0x60] sm:$0xff] %v2999_v17  ;;  %v3039_v0 = vld [vmem:[#allocation2 + $0x8] sm:$0xff] }
 0x2ce   :  { %892 = vst [vmem:[#allocation2 + $0x70] sm:$0xff] %v3002_v44 }
 0x2cf   :  { %893 = vst [vmem:[#allocation2 + $0x78] sm:$0xff] %v3005_v19 }
 0x2d0   :  { %3820 = vst [vmem:[#allocation17_spill] sm:$0xff] %v3027_v24 }
 0x2d1   :  { %3822 = vst [vmem:[#allocation19_spill] sm:$0xff] %v3039_v0 }
 0x2d3   :  { %1502 = vrot.lane.b32.xlu1 %v2962_v55, %s2508_s0  ;;  %1200 = vrot.lane.b32.xlu2 %v2955_v50, %s2509_s22  ;;  %v3025_v12 = vld [vmem:[#allocation2 + $0x38] sm:$0xff] }
 0x2d4   :  { %1318 = vrot.lane.b32.xlu0 %v2962_v55, %s2507_s19  ;;  %v3033_v48 = vld [vmem:[#allocation2 + $0x60] sm:$0xff] }
 0x2d5   :  { %v3037_v56 = vld [vmem:[#allocation2 + $0x70] sm:$0xff] }
 0x2d6   :  { %3821 = vst [vmem:[#allocation18_spill] sm:$0xff] %v3037_v56  ;;  %v3043_v60 = vld [vmem:[#allocation2 + $0x78] sm:$0xff] }
 0x2d7   :  { %3823 = vst [vmem:[#allocation20_spill] sm:$0xff] %v3043_v60 }
 0x2db   :  { %1316 = vrot.lane.b32.xlu1 %v2959_v53, %s2507_s19  ;;  %1506 = vrot.lane.b32.xlu2 %v2968_v23, %s2508_s0 }
 0x2dc   :  { %1202 = vrot.lane.b32.xlu0 %v2959_v53, %s2509_s22 }
 0x2e3   :  { %1410 = vrot.lane.b32.xlu1 %v2962_v55, %s2506_s18  ;;  %1320 = vrot.lane.b32.xlu2 %v2965_v8, %s2507_s19 }
 0x2e4   :  { %1590 = vrot.lane.b32.xlu0 %v2955_v50, %s2505_s17 }
 0x2eb   :  { %1412 = vrot.lane.b32.xlu1 %v2965_v8, %s2506_s18  ;;  %1016 = vrot.lane.b32.xlu2 %v2955_v50, %s2504_s16 }
 0x2ec   :  { %1206 = vrot.lane.b32.xlu0 %v2965_v8, %s2509_s22 }
 0x2f3   :  { %1108 = vrot.lane.b32.xlu1 %v2955_v50, %s2510_s23  ;;  %1322 = vrot.lane.b32.xlu2 %v2968_v23, %s2507_s19 }
 0x2f4   :  { %1112 = vrot.lane.b32.xlu0 %v2962_v55, %s2510_s23 }
 0x2fb   :  { %1414 = vrot.lane.b32.xlu1 %v2968_v23, %s2506_s18  ;;  %924 = vrot.lane.b32.xlu2 %v2955_v50, %s2503_s13 }
 0x2fc   :  { %1020 = vrot.lane.b32.xlu0 %v2962_v55, %s2504_s16 }
 0x303   :  { %1110 = vrot.lane.b32.xlu1 %v2959_v53, %s2510_s23  ;;  %1018 = vrot.lane.b32.xlu2 %v2959_v53, %s2504_s16 }
 0x304   :  { %1416 = vrot.lane.b32.xlu0 %v2971_v58, %s2506_s18 }
 0x30b   :  { %1592 = vrot.lane.b32.xlu1 %v2959_v53, %s2505_s17  ;;  %1594 = vrot.lane.b32.xlu2 %v2962_v55, %s2505_s17 }
 0x30c   :  { %930 = vrot.lane.b32.xlu0 %v2965_v8, %s2503_s13 }
 0x313   :  { %1204 = vrot.lane.b32.xlu1 %v2962_v55, %s2509_s22  ;;  %1114 = vrot.lane.b32.xlu2 %v2965_v8, %s2510_s23 }
 0x314   :  { %1596 = vrot.lane.b32.xlu0 %v2965_v8, %s2505_s17 }
 0x31b   :  { %926 = vrot.lane.b32.xlu1 %v2959_v53, %s2503_s13  ;;  %928 = vrot.lane.b32.xlu2 %v2962_v55, %s2503_s13 }
 0x31c   :  { %1210 = vrot.lane.b32.xlu0 %v2971_v58, %s2509_s22 }
 0x31d   :  { %v1501_v62 = vpop.permute.xlu2 %1500 }
 0x323   :  { %1508 = vrot.lane.b32.xlu1 %v2971_v58, %s2508_s0  ;;  %1324 = vrot.lane.b32.xlu2 %v2971_v58, %s2507_s19 }
 0x324   :  { %1600 = vrot.lane.b32.xlu0 %v2971_v58, %s2505_s17 }
 0x325   :  { %v1505_v63 = vpop.permute.xlu2 %1504 }
 0x32b   :  { %1022 = vrot.lane.b32.xlu1 %v2965_v8, %s2504_s16  ;;  %1598 = vrot.lane.b32.xlu2 %v2968_v23, %s2505_s17 }
 0x32c   :  { %1026 = vrot.lane.b32.xlu0 %v2971_v58, %s2504_s16 }
 0x32d   :  { %v1201_v55 = vpop.permute.xlu2 %1200 }
 0x32e   :  { %v3115_v1 = vsel %vm278_vm8, %v2902_v27, %v1201_v55 }
 0x333   :  { %1208 = vrot.lane.b32.xlu1 %v2968_v23, %s2509_s22  ;;  %1116 = vrot.lane.b32.xlu2 %v2968_v23, %s2510_s23 }
 0x334   :  { %1422 = vrot.lane.b32.xlu0 %v2993_v15, %s2506_s18 }
 0x335   :  { %v1499_v8 = vpop.permute.xlu1 %1498  ;;  %v3123_v2 = vpop.permute.xlu2 %1506 }
 0x336   :  { %v3126_v32 = vsel %vm445_vm5, %v1499_v8, %v1501_v62  ;;  %v1407_v49 = vpop.permute.xlu0 %1406  ;;  %v3130_v27 = vsel %vm445_vm5, %v1505_v63, %v3123_v2 }
 0x33b   :  { %1118 = vrot.lane.b32.xlu1 %v2971_v58, %s2510_s23  ;;  %1024 = vrot.lane.b32.xlu2 %v2968_v23, %s2504_s16 }
 0x33c   :  { %1330 = vrot.lane.b32.xlu0 %v2993_v15, %s2507_s19 }
 0x33d   :  { %v1409_v54 = vpop.permute.xlu1 %1408  ;;  %v1321_v59 = vpop.permute.xlu2 %1320 }
 0x33e   :  { %v3139_v3 = vsel %vm391_vm0, %v1407_v49, %v1409_v54  ;;  %v1315_v4 = vpop.permute.xlu0 %1314 }
 0x343   :  { %1514 = vrot.lane.b32.xlu2 %v2993_v15, %s2508_s0  ;;  %1512 = vrot.lane.b32.xlu1 %v2990_v16, %s2508_s0 }
 0x344   :  { %1518 = vrot.lane.b32.xlu0 %v2999_v17, %s2508_s0 }
 0x345   :  { %v1503_v5 = vpop.permute.xlu1 %1502  ;;  %v1017_v6 = vpop.permute.xlu2 %1016 }
 0x346   :  { %v3148_v11 = vsel %vm445_vm5, %v1501_v62, %v1503_v5  ;;  %v3151_v42 = vsel %vm445_vm5, %v1503_v5, %v1505_v63  ;;  %v1319_v57 = vpop.permute.xlu0 %1318  ;;  %v3158_v10 = vsel %vm177_vm1, %v2906_v29, %v1017_v6 }
 0x347   :  { %v3154_v7 = vsel %vm344_vm3, %v1319_v57, %v1321_v59  ;;  %1066 = vst [vmem:[#allocation3 + $0xb8] sm:$0xff] %v3158_v10 }
 0x34b   :  { %1332 = vrot.lane.b32.xlu1 %v2996_v31, %s2507_s19  ;;  %1420 = vrot.lane.b32.xlu2 %v2990_v16, %s2506_s18 }
 0x34c   :  { %1520 = vrot.lane.b32.xlu0 %v3002_v44, %s2508_s0 }
 0x34d   :  { %v1317_v22 = vpop.permute.xlu1 %1316  ;;  %v3167_v62 = vpop.permute.xlu2 %1322 }
 0x34e   :  { %v3170_v63 = vsel %vm344_vm3, %v1315_v4, %v1317_v22  ;;  %v3173_v29 = vsel %vm344_vm3, %v1317_v22, %v1319_v57  ;;  %v3175_v8 = vpop.permute.xlu0 %1202  ;;  %v3183_v5 = vsel %vm344_vm3, %v1321_v59, %v3167_v62 }
 0x34f   :  { %v3179_v49 = vsel %vm278_vm8, %v1201_v55, %v3175_v8 }
 0x353   :  { %1516 = vrot.lane.b32.xlu2 %v2996_v31, %s2508_s0  ;;  %1214 = vrot.lane.b32.xlu1 %v2990_v16, %s2509_s22 }
 0x354   :  { %1122 = vrot.lane.b32.xlu0 %v2990_v16, %s2510_s23 }
 0x355   :  { %v1411_v4 = vpop.permute.xlu1 %1410  ;;  %v3191_v57 = vpop.permute.xlu2 %924 }
 0x356   :  { %v3194_v22 = vsel %vm391_vm0, %v1409_v54, %v1411_v4  ;;  %v1591_v55 = vpop.permute.xlu0 %1590  ;;  %v3199_v59 = vsel %vm123_vm4, %v2912_v36, %v3191_v57 }
 0x357   :  { %974 = vst [vmem:[#allocation3 + $0x2a8] sm:$0xff] %v3199_v59 }
 0x35b   :  { %1328 = vrot.lane.b32.xlu2 %v2990_v16, %s2507_s19  ;;  %1216 = vrot.lane.b32.xlu1 %v2993_v15, %s2509_s22 }
 0x35c   :  { %1334 = vrot.lane.b32.xlu0 %v2999_v17, %s2507_s19 }
 0x35d   :  { %v1413_v61 = vpop.permute.xlu1 %1412  ;;  %v1019_v54 = vpop.permute.xlu2 %1018 }
 0x35e   :  { %v3209_v51 = vsel %vm391_vm0, %v1411_v4, %v1413_v61  ;;  %v3211_v25 = vpop.permute.xlu0 %1206  ;;  %v3214_v36 = vsel %vm177_vm1, %v1017_v6, %v1019_v54 }
 0x35f   :  { %1067 = vst [vmem:[#allocation3 + $0x138] sm:$0xff] %v3214_v36 }
 0x363   :  { %1424 = vrot.lane.b32.xlu2 %v2996_v31, %s2506_s18  ;;  %1030 = vrot.lane.b32.xlu1 %v2990_v16, %s2504_s16 }
 0x364   :  { %1336 = vrot.lane.b32.xlu0 %v3002_v44, %s2507_s19 }
 0x365   :  { %v1109_v52 = vpop.permute.xlu1 %1108  ;;  %v1595_v47 = vpop.permute.xlu2 %1594 }
 0x366   :  { %v1113_v4 = vpop.permute.xlu0 %1112  ;;  %v3225_v33 = vsel %vm224_vm7, %v2914_v37, %v1109_v52 }
 0x367   :  { %1158 = vst [vmem:[#allocation3 + $0x228] sm:$0xff] %v3225_v33 }
 0x36b   :  { %1426 = vrot.lane.b32.xlu2 %v2999_v17, %s2506_s18  ;;  %938 = vrot.lane.b32.xlu1 %v2990_v16, %s2503_s13 }
 0x36c   :  { %1606 = vrot.lane.b32.xlu0 %v2993_v15, %s2505_s17 }
 0x36d   :  { %v1415_v6 = vpop.permute.xlu1 %1414  ;;  %v1115_v26 = vpop.permute.xlu2 %1114 }
 0x36e   :  { %v3234_v18 = vpop.permute.xlu0 %1020  ;;  %v3237_v14 = vsel %vm391_vm0, %v1413_v61, %v1415_v6  ;;  %v3240_v37 = vsel %vm224_vm7, %v1113_v4, %v1115_v26 }
 0x36f   :  { %v3244_v13 = vsel %vm177_vm1, %v1019_v54, %v3234_v18  ;;  %1161 = vst [vmem:[#allocation3 + $0x158] sm:$0xff] %v3240_v37 }
 0x370   :  { %1068 = vst [vmem:[#allocation3 + $0x1f8] sm:$0xff] %v3244_v13 }
 0x373   :  { %1428 = vrot.lane.b32.xlu2 %v3002_v44, %s2506_s18  ;;  %1220 = vrot.lane.b32.xlu1 %v2999_v17, %s2509_s22 }
 0x374   :  { %1032 = vrot.lane.b32.xlu0 %v2993_v15, %s2504_s16 }
 0x375   :  { %v1111_v61 = vpop.permute.xlu1 %1110  ;;  %v929_v0 = vpop.permute.xlu2 %928 }
 0x376   :  { %v1417_v60 = vpop.permute.xlu0 %1416  ;;  %v3255_v24 = vsel %vm224_vm7, %v1109_v52, %v1111_v61  ;;  %v3265_v45 = vsel %vm224_vm7, %v1111_v61, %v1113_v4 }
 0x377   :  { %v3258_v54 = vsel %vm391_vm0, %v1415_v6, %v1417_v60  ;;  %v3262_v56 = vsel %vm391_vm0, %v1417_v60, %v2918_v39  ;;  %1159 = vst [vmem:[#allocation3 + $0x120] sm:$0xff] %v3255_v24 }
 0x378   :  { %3824 = vst [vmem:[#allocation21_spill] sm:$0xff] %v3258_v54 }
 0x379   :  { %3825 = vst [vmem:[#allocation22_spill] sm:$0xff] %v3262_v56 }
 0x37a   :  { %1160 = vst [vmem:[#allocation3 + $0x148] sm:$0xff] %v3265_v45 }
 0x37b   :  { %1124 = vrot.lane.b32.xlu2 %v2993_v15, %s2510_s23  ;;  %1126 = vrot.lane.b32.xlu1 %v2996_v31, %s2510_s23 }
 0x37c   :  { %1608 = vrot.lane.b32.xlu0 %v2996_v31, %s2505_s17 }
 0x37d   :  { %v1593_v52 = vpop.permute.xlu1 %1592  ;;  %v1325_v6 = vpop.permute.xlu2 %1324 }
 0x37e   :  { %v3275_v39 = vpop.permute.xlu0 %930  ;;  %v3278_v60 = vsel %vm492_vm2, %v1591_v55, %v1593_v52  ;;  %v3281_v4 = vsel %vm492_vm2, %v1593_v52, %v1595_v47  ;;  %v3289_v56 = vsel %vm344_vm3, %v3167_v62, %v1325_v6  ;;  %v3294_v54 = vsel %vm344_vm3, %v1325_v6, %v2924_v35 }
 0x37f   :  { %3826 = vst [vmem:[#allocation23_spill] sm:$0xff] %v3275_v39  ;;  %v3285_v61 = vsel %vm123_vm4, %v929_v0, %v3275_v39 }
 0x380   :  { %3827 = vst [vmem:[#allocation24_spill] sm:$0xff] %v3285_v61 }
 0x381   :  { %3828 = vst [vmem:[#allocation25_spill] sm:$0xff] %v3289_v56 }
 0x382   :  { %977 = vst [vmem:[#allocation3 + $0x2c0] sm:$0xff] %v3285_v61 }
 0x383   :  { %3829 = vst [vmem:[#allocation26_spill] sm:$0xff] %v3294_v54  ;;  %1604 = vrot.lane.b32.xlu2 %v2990_v16, %s2505_s17  ;;  %1034 = vrot.lane.b32.xlu1 %v2996_v31, %s2504_s16 }
 0x384   :  { %1128 = vrot.lane.b32.xlu0 %v2999_v17, %s2510_s23 }
 0x385   :  { %v1205_v55 = vpop.permute.xlu1 %1204  ;;  %v1599_v52 = vpop.permute.xlu2 %1598 }
 0x386   :  { %v1597_v39 = vpop.permute.xlu0 %1596  ;;  %v3304_v62 = vsel %vm278_vm8, %v3175_v8, %v1205_v55  ;;  %v3308_v35 = vsel %vm278_vm8, %v1205_v55, %v3211_v25 }
 0x387   :  { %v3311_v6 = vsel %vm492_vm2, %v1595_v47, %v1597_v39  ;;  %v3314_v54 = vsel %vm492_vm2, %v1597_v39, %v1599_v52 }
 0x388   :  { %3830 = vst [vmem:[#allocation27_spill] sm:$0xff] %v3314_v54 }
 0x38b   :  { %1218 = vrot.lane.b32.xlu2 %v2996_v31, %s2509_s22  ;;  %1430 = vrot.lane.b32.xlu1 %v3005_v19, %s2506_s18 }
 0x38c   :  { %942 = vrot.lane.b32.xlu0 %v2996_v31, %s2503_s13 }
 0x38d   :  { %v927_v8 = vpop.permute.xlu1 %926  ;;  %v1117_v56 = vpop.permute.xlu2 %1116 }
 0x38e   :  { %v1211_v61 = vpop.permute.xlu0 %1210  ;;  %v3324_v55 = vsel %vm123_vm4, %v3191_v57, %v927_v8  ;;  %v3327_v47 = vsel %vm123_vm4, %v927_v8, %v929_v0  ;;  %v3330_v39 = vsel %vm224_vm7, %v1115_v26, %v1117_v56 }
 0x38f   :  { %3831 = vst [vmem:[#allocation28_spill] sm:$0xff] %v3330_v39 }
 0x390   :  { %975 = vst [vmem:[#allocation3 + $0x268] sm:$0xff] %v3324_v55 }
 0x391   :  { %976 = vst [vmem:[#allocation3 + $0x310] sm:$0xff] %v3327_v47 }
 0x392   :  { %1162 = vst [vmem:[#allocation3 + $0x2d0] sm:$0xff] %v3330_v39 }
 0x393   :  { %940 = vrot.lane.b32.xlu2 %v2993_v15, %s2503_s13  ;;  %944 = vrot.lane.b32.xlu1 %v2999_v17, %s2503_s13 }
 0x394   :  { %1338 = vrot.lane.b32.xlu0 %v3005_v19, %s2507_s19 }
 0x395   :  { %v1509_v31 = vpop.permute.xlu1 %1508  ;;  %v1025_v0 = vpop.permute.xlu2 %1024 }
 0x396   :  { %v1601_v57 = vpop.permute.xlu0 %1600  ;;  %v3343_v26 = vsel %vm445_vm5, %v3123_v2, %v1509_v31  ;;  %v3354_v54 = vsel %vm445_vm5, %v1509_v31, %v2910_v34 }
 0x397   :  { %v3346_v8 = vsel %vm492_vm2, %v1599_v52, %v1601_v57  ;;  %v3350_v39 = vsel %vm492_vm2, %v1601_v57, %v2930_v46 }
 0x398   :  { %3832 = vst [vmem:[#allocation29_spill] sm:$0xff] %v3346_v8 }
 0x39b   :  { %1522 = vrot.lane.b32.xlu2 %v3005_v19, %s2508_s0  ;;  %1610 = vrot.lane.b32.xlu1 %v2999_v17, %s2505_s17 }
 0x39c   :  { %1612 = vrot.lane.b32.xlu0 %v3002_v44, %s2505_s17 }
 0x39d   :  { %v1023_v2 = vpop.permute.xlu1 %1022  ;;  %v1515_v52 = vpop.permute.xlu2 %1514 }
 0x39e   :  { %v1027_v8 = vpop.permute.xlu0 %1026  ;;  %v3364_v46 = vsel %vm177_vm1, %v3234_v18, %v1023_v2  ;;  %v3367_v57 = vsel %vm177_vm1, %v1023_v2, %v1025_v0 }
 0x39f   :  { %3833 = vst [vmem:[#allocation30_spill] sm:$0xff] %v3367_v57  ;;  %v3370_v34 = vsel %vm177_vm1, %v1025_v0, %v1027_v8 }
 0x3a0   :  { %3834 = vst [vmem:[#allocation31_spill] sm:$0xff] %v3370_v34 }
 0x3a1   :  { %1069 = vst [vmem:[#allocation3 + $0x78] sm:$0xff] %v3364_v46 }
 0x3a2   :  { %1071 = vst [vmem:[#allocation3 + $0xd0] sm:$0xff] %v3370_v34 }
 0x3a3   :  { %1070 = vst [vmem:[#allocation3 + $0x338] sm:$0xff] %v3367_v57  ;;  %1036 = vrot.lane.b32.xlu2 %v2999_v17, %s2504_s16  ;;  %1224 = vrot.lane.b32.xlu1 %v3005_v19, %s2509_s22 }
 0x3a4   :  { %1130 = vrot.lane.b32.xlu0 %v3002_v44, %s2510_s23 }
 0x3a5   :  { %v1209_v18 = vpop.permute.xlu1 %1208  ;;  %v1421_v31 = vpop.permute.xlu2 %1420 }
 0x3a6   :  { %v3383_v0 = vsel %vm278_vm8, %v3211_v25, %v1209_v18  ;;  %v3386_v8 = vsel %vm278_vm8, %v1209_v18, %v1211_v61  ;;  %v1423_v2 = vpop.permute.xlu0 %1422 }
 0x3a7   :  { %3835 = vst [vmem:[#allocation32_spill] sm:$0xff] %v3383_v0  ;;  %v1440_v57 = vsel %vm391_vm0, %v1421_v31, %v1423_v2 }
 0x3a8   :  { %3836 = vst [vmem:[#allocation33_spill] sm:$0xff] %v3386_v8 }
 0x3ab   :  { %932 = vrot.lane.b32.xlu2 %v2968_v23, %s2503_s13  ;;  %1614 = vrot.lane.b32.xlu1 %v3005_v19, %s2505_s17 }
 0x3ac   :  { %1038 = vrot.lane.b32.xlu0 %v3002_v44, %s2504_s16 }
 0x3ad   :  { %v1119_v17 = vpop.permute.xlu1 %1118  ;;  %v1517_v34 = vpop.permute.xlu2 %1516 }
 0x3ae   :  { %v3396_v25 = vsel %vm224_vm7, %v1117_v56, %v1119_v17  ;;  %v1331_v0 = vpop.permute.xlu0 %1330  ;;  %v1533_v61 = vsel %vm445_vm5, %v1515_v52, %v1517_v34 }
 0x3af   :  { %3837 = vst [vmem:[#allocation34_spill] sm:$0xff] %v3396_v25  ;;  %v1805_v18 = vpack.c.bf16 %v1533_v61, %v3148_v11 }
 0x3b0   :  { %1163 = vst [vmem:[#allocation3 + $0x198] sm:$0xff] %v3396_v25 }
 0x3b1   :  { %1857 = vmatpush.bf16.msrb.mxu0 %v1805_v18 }
 0x3b3   :  { %1222 = vrot.lane.b32.xlu2 %v3002_v44, %s2509_s22  ;;  %1040 = vrot.lane.b32.xlu1 %v3005_v19, %s2504_s16  ;;  %s2383_s22 = sshll.u32 %s3790_s8, 4  ;;  %s2384_s22 = int_to_ptr.hbm [resolvable:$true] %s2383_s22 }
 0x3b4   :  { %946 = vrot.lane.b32.xlu0 %v3002_v44, %s2503_s13  ;;  %v1798_v44 = vpack.c.bf16 %v1440_v57, %v3139_v3 }
 0x3b5   :  { %v1513_v23 = vpop.permute.xlu1 %1512  ;;  %v1329_v56 = vpop.permute.xlu2 %1328 }
 0x3b6   :  { %v1519_v31 = vpop.permute.xlu0 %1518  ;;  %v1532_v17 = vsel %vm445_vm5, %v1513_v23, %v1515_v52  ;;  %v1348_v8 = vsel %vm344_vm3, %v1329_v56, %v1331_v0 }
 0x3b7   :  { %v3410_v25 = vsel %vm445_vm5, %v1517_v34, %v1519_v31  ;;  %v1804_v11 = vpack.c.bf16 %v1532_v17, %v3126_v32  ;;  %v1792_v56 = vpack.c.bf16 %v1348_v8, %v3170_v63 }
 0x3b9   :  { %1829 = vmatpush.bf16.msrb.mxu2 %v1804_v11 }
 0x3bb   :  { %1132 = vrot.lane.b32.xlu2 %v3005_v19, %s2510_s23  ;;  %934 = vrot.lane.b32.xlu1 %v2971_v58, %s2503_s13  ;;  %v1786_v58 = vpack.c.bf16 %v2990_v16, %v2955_v50  ;;  %v1787_v50 = vpack.c.bf16 %v2993_v15, %v2959_v53 }
 0x3bd   :  { %v1333_v61 = vpop.permute.xlu1 %1332  ;;  %v1425_v18 = vpop.permute.xlu2 %1424  ;;  %1830 = vmatpush.bf16.msrb.mxu2 %v1798_v44 }
 0x3be   :  { %v3418_v52 = vpop.permute.xlu0 %1520  ;;  %v1349_v23 = vsel %vm344_vm3, %v1331_v0, %v1333_v61  ;;  %v1441_v34 = vsel %vm391_vm0, %v1423_v2, %v1425_v18 }
 0x3bf   :  { %v1535_v32 = vsel %vm445_vm5, %v1519_v31, %v3418_v52  ;;  %v1799_v17 = vpack.c.bf16 %v1441_v34, %v3194_v22  ;;  %v1793_v3 = vpack.c.bf16 %v1349_v23, %v3173_v29 }
 0x3c1   :  { %1831 = vmatpush.bf16.msrb.mxu2 %v1792_v56  ;;  %1858 = vmatpush.bf16.msrb.mxu0 %v1799_v17 }
 0x3c3   :  { %948 = vrot.lane.b32.xlu2 %v3005_v19, %s2503_s13 }
 0x3c5   :  { %v1215_v57 = vpop.permute.xlu1 %1214  ;;  %v1427_v0 = vpop.permute.xlu2 %1426  ;;  %1832 = vmatpush.bf16.msrb.mxu2 %v1786_v58  ;;  %1859 = vmatpush.bf16.msrb.mxu0 %v1793_v3 }
 0x3c6   :  { %v1232_v2 = vsel %vm278_vm8, %v2908_v30, %v1215_v57  ;;  %v1123_v63 = vpop.permute.xlu0 %1122  ;;  %v1442_v22 = vsel %vm391_vm0, %v1425_v18, %v1427_v0 }
 0x3c7   :  { %v1140_v8 = vsel %vm224_vm7, %v2904_v28, %v1123_v63  ;;  %v1780_v19 = vpack.c.bf16 %v1232_v2, %v3115_v1  ;;  %v1807_v2 = vpack.c.bf16 %v1535_v32, %v3130_v27  ;;  %v2405_v27 = vld [vmem:[#allocation4] sm:$0xf]  ;;  %v2419_v32 = vld [vmem:[#allocation4 + $0x4] sm:$0xf0] }
 0x3c8   :  { %v1774_v16 = vpack.c.bf16 %v1140_v8, %v3225_v33 }
 0x3c9   :  { %1833 = vmatpush.bf16.msrb.mxu2 %v1780_v19  ;;  %1860 = vmatpush.bf16.msrb.mxu0 %v1787_v50 }
 0x3cd   :  { %v1217_v29 = vpop.permute.xlu1 %1216  ;;  %v3440_v31 = vpop.permute.xlu2 %1428  ;;  %1834 = vmatpush.bf16.msrb.mxu2 %v1774_v16 }
 0x3ce   :  { %v1233_v30 = vsel %vm278_vm8, %v1215_v57, %v1217_v29  ;;  %v1335_v11 = vpop.permute.xlu0 %1334  ;;  %v1443_v44 = vsel %vm391_vm0, %v1427_v0, %v3440_v31 }
 0x3cf   :  { %v1350_v28 = vsel %vm344_vm3, %v1333_v61, %v1335_v11  ;;  %v1781_v1 = vpack.c.bf16 %v1233_v30, %v3179_v49 }
 0x3d1   :  { %1861 = vmatpush.bf16.msrb.mxu0 %v1781_v1 }
 0x3d5   :  { %v1031_v53 = vpop.permute.xlu1 %1030  ;;  %v1125_v15 = vpop.permute.xlu2 %1124 }
 0x3d6   :  { %v3447_v18 = vpop.permute.xlu0 %1336  ;;  %v1048_v33 = vsel %vm177_vm1, %v2920_v40, %v1031_v53  ;;  %v1141_v23 = vsel %vm224_vm7, %v1123_v63, %v1125_v15  ;;  %v2407_v63 = vld [vmem:[#allocation4 + $0x8] sm:$0xf0] }
 0x3d7   :  { %v1351_v34 = vsel %vm344_vm3, %v1335_v11, %v3447_v18  ;;  %1072 = vst [vmem:[#allocation3 + $0x358] sm:$0xff] %v1048_v33  ;;  %v1768_v56 = vpack.c.bf16 %v1048_v33, %v3158_v10  ;;  %v1775_v61 = vpack.c.bf16 %v1141_v23, %v3255_v24  ;;  %v1806_v24 = vpack.c.bf16 %v3410_v25, %v3151_v42  ;;  %v2418_v10 = vld [vmem:[#allocation4 + $0x4] sm:$0xf] }
 0x3d8   :  { %v3465_v8 = vor.u32 %v2418_v10, %v2407_v63  ;;  %v3838_v33 = vpack.c.bf16 %v3033_v48, %v3019_v21 }
 0x3d9   :  { %1835 = vmatpush.bf16.msrb.mxu2 %v1768_v56  ;;  %1862 = vmatpush.bf16.msrb.mxu0 %v1775_v61 }
 0x3dd   :  { %v939_v49 = vpop.permute.xlu1 %938  ;;  %v1605_v17 = vpop.permute.xlu2 %1604 }
 0x3de   :  { %v1607_v58 = vpop.permute.xlu0 %1606  ;;  %v956_v3 = vsel %vm123_vm4, %v2926_v43, %v939_v49  ;;  %v1801_v43 = vpack.c.bf16 %v1443_v44, %v3237_v14  ;;  %v3475_v14 = vor.u32 %v2419_v32, %v2405_v27  ;;  %v3842_v27 = vld [vmem:[#allocation27_spill] sm:$0xff] }
 0x3df   :  { %980 = vst [vmem:[#allocation3 + $0x130] sm:$0xff] %v956_v3  ;;  %v1624_v40 = vsel %vm492_vm2, %v1605_v17, %v1607_v58  ;;  %v1762_v57 = vpack.c.bf16 %v956_v3, %v3199_v59 }
 0x3e0   :  { %v1810_v0 = vpack.c.bf16 %v1624_v40, %v3278_v60  ;;  %v1800_v60 = vpack.c.bf16 %v1442_v22, %v3209_v51  ;;  %v1795_v22 = vpack.c.bf16 %v1351_v34, %v3183_v5 }
 0x3e1   :  { %1836 = vmatpush.bf16.msrb.mxu2 %v1762_v57 }
 0x3e2   :  { %1850 = vmatpush.bf16.msra.mxu3 %v1810_v0 }
 0x3e4   :  { %1837 = vmatmul.bf16.vlgmr.msrb.gmra.mxu2 %v3475_v14 }
 0x3e5   :  { %1913 = vmatpush.bf16.msra.mxu2 %v1807_v2  ;;  %v3467_v19 = vpop.permute.xlu1 %1220  ;;  %v1219_v59 = vpop.permute.xlu2 %1218  ;;  %2411 = vmatmul.msk.bf16.vlgmr.msra.gmra.mxu3 %vm1825_vm12, %v3465_v8  ;;  %v3841_v2 = vld [vmem:[#allocation24_spill] sm:$0xff] }
 0x3e6   :  { %1885 = vmatpush.bf16.msrb.mxu3 %v1806_v24  ;;  %v1033_v50 = vpop.permute.xlu0 %1032  ;;  %v1234_v42 = vsel %vm278_vm8, %v1217_v29, %v1219_v59  ;;  %v1235_v25 = vsel %vm278_vm8, %v1219_v59, %v3467_v19  ;;  %v1794_v29 = vpack.c.bf16 %v1350_v28, %v3154_v7 }
 0x3e7   :  { %v1049_v16 = vsel %vm177_vm1, %v1031_v53, %v1033_v50  ;;  %v1783_v23 = vpack.c.bf16 %v1235_v25, %v3308_v35  ;;  %v3843_v25 = vld [vmem:[#allocation21_spill] sm:$0xff] }
 0x3e8   :  { %1073 = vst [vmem:[#allocation3 + $0x190] sm:$0xff] %v1049_v16  ;;  %v1769_v51 = vpack.c.bf16 %v1049_v16, %v3214_v36  ;;  %v3839_v36 = vpack.c.bf16 %v3025_v12, %v3017_v20 }
 0x3e9   :  { %1914 = vmatpush.bf16.msra.mxu2 %v1801_v43 }
 0x3ea   :  { %1886 = vmatpush.bf16.msrb.mxu3 %v1800_v60  ;;  %1863 = vmatpush.bf16.msrb.mxu0 %v1769_v51 }
 0x3ed   :  { %1915 = vmatpush.bf16.msra.mxu2 %v1795_v22  ;;  %v1127_v30 = vpop.permute.xlu1 %1126  ;;  %v941_v11 = vpop.permute.xlu2 %940 }
 0x3ee   :  { %1887 = vmatpush.bf16.msrb.mxu3 %v1794_v29  ;;  %v1609_v44 = vpop.permute.xlu0 %1608  ;;  %v1142_v1 = vsel %vm224_vm7, %v1125_v15, %v1127_v30  ;;  %v957_v53 = vsel %vm123_vm4, %v939_v49, %v941_v11  ;;  %v1782_v15 = vpack.c.bf16 %v1234_v42, %v3304_v62 }
 0x3ef   :  { %v1625_v5 = vsel %vm492_vm2, %v1607_v58, %v1609_v44  ;;  %v1763_v7 = vpack.c.bf16 %v957_v53, %v3324_v55  ;;  %981 = vst [vmem:[#allocation3 + $0x140] sm:$0xff] %v957_v53  ;;  %v1776_v20 = vpack.c.bf16 %v1142_v1, %v3265_v45  ;;  %v3846_v1 = vld [vmem:[#allocation26_spill] sm:$0xff] }
 0x3f0   :  { %v1811_v28 = vpack.c.bf16 %v1625_v5, %v3281_v4 }
 0x3f1   :  { %1916 = vmatpush.bf16.msra.mxu2 %v3838_v33  ;;  %1864 = vmatpush.bf16.msrb.mxu0 %v1763_v7  ;;  %v3847_v7 = vld [vmem:[#allocation16_spill] sm:$0xff] }
 0x3f2   :  { %1888 = vmatpush.bf16.msrb.mxu3 %v3839_v36  ;;  %1878 = vmatpush.bf16.msra.mxu1 %v1811_v28 }
 0x3f4   :  { %1865 = vmatmul.bf16.vlgmr.msrb.gmra.mxu0 %v3475_v14 }
 0x3f5   :  { %1917 = vmatpush.bf16.msra.mxu2 %v1783_v23  ;;  %v1035_v21 = vpop.permute.xlu1 %1034  ;;  %v1523_v48 = vpop.permute.xlu2 %1522  ;;  %2412 = vmatmul.msk.bf16.vlgmr.msra.gmra.mxu1 %vm1825_vm12, %v3465_v8  ;;  %v3848_v23 = vld [vmem:[#allocation18_spill] sm:$0xff] }
 0x3f6   :  { %1889 = vmatpush.bf16.msrb.mxu3 %v1782_v15  ;;  %v1129_v12 = vpop.permute.xlu0 %1128  ;;  %v1050_v4 = vsel %vm177_vm1, %v1033_v50, %v1035_v21  ;;  %v1536_v35 = vsel %vm445_vm5, %v3418_v52, %v1523_v48  ;;  %v1537_v55 = vsel %vm445_vm5, %v1523_v48, %v2932_v9  ;;  %v3849_v15 = vld [vmem:[#allocation17_spill] sm:$0xff] }
 0x3f7   :  { %v1143_v62 = vsel %vm224_vm7, %v1127_v30, %v1129_v12  ;;  %1074 = vst [vmem:[#allocation3 + $0x320] sm:$0xff] %v1050_v4  ;;  %v1770_v34 = vpack.c.bf16 %v1050_v4, %v3244_v13  ;;  %v1808_v50 = vpack.c.bf16 %v1536_v35, %v3343_v26  ;;  %v1809_v42 = vpack.c.bf16 %v1537_v55, %v3354_v54  ;;  %v3854_v35 = vld [vmem:[#allocation29_spill] sm:$0xff] }
 0x3f8   :  { %v1777_v45 = vpack.c.bf16 %v1143_v62, %v3240_v37 }
 0x3fa   :  { %1890 = vmatpush.bf16.msrb.mxu3 %v1776_v20  ;;  %1918 = vmatpush.bf16.msra.mxu2 %v1777_v45  ;;  %v3851_v20 = vld [vmem:[#allocation20_spill] sm:$0xff] }
 0x3fd   :  { %v1431_v56 = vpop.permute.xlu1 %1430  ;;  %v1037_v61 = vpop.permute.xlu2 %1036 }
 0x3fe   :  { %1891 = vmatpush.bf16.msrb.mxu3 %v1770_v34  ;;  %v943_v49 = vpop.permute.xlu0 %942  ;;  %v1444_v17 = vsel %vm391_vm0, %v3440_v31, %v1431_v56  ;;  %v1445_v52 = vsel %vm391_vm0, %v1431_v56, %v2916_v38  ;;  %v1051_v58 = vsel %vm177_vm1, %v1035_v21, %v1037_v61  ;;  %v3850_v21 = vpack.c.bf16 %v3848_v23, %v3849_v15  ;;  %v3855_v34 = vld [vmem:[#allocation32_spill] sm:$0xff]  ;;  %v3856_v56 = vld [vmem:[#allocation33_spill] sm:$0xff] }
 0x3ff   :  { %v958_v9 = vsel %vm123_vm4, %v941_v11, %v943_v49  ;;  %v1771_v3 = vpack.c.bf16 %v1051_v58, %v3364_v46  ;;  %1075 = vst [vmem:[#allocation3 + $0x208] sm:$0xff] %v1051_v58  ;;  %v1802_v16 = vpack.c.bf16 %v1444_v17, %v3843_v25  ;;  %v3845_v11 = vld [vmem:[#allocation25_spill] sm:$0xff]  ;;  %v3857_v17 = vld [vmem:[#allocation28_spill] sm:$0xff]  ;;  %v3858_v58 = vld [vmem:[#allocation34_spill] sm:$0xff] }
 0x400   :  { %982 = vst [vmem:[#allocation3 + $0xf0] sm:$0xff] %v958_v9  ;;  %v1764_v13 = vpack.c.bf16 %v958_v9, %v3327_v47  ;;  %v3840_v47 = vld [vmem:[#allocation23_spill] sm:$0xff] }
 0x401   :  { %1919 = vmatpush.bf16.msra.mxu2 %v1771_v3 }
 0x402   :  { %1892 = vmatpush.bf16.msrb.mxu3 %v1764_v13 }
 0x405   :  { %v3515_v37 = vpop.permute.xlu1 %944  ;;  %v3517_v40 = vpop.permute.xlu2 %932  ;;  %1893 = vmatmul.bf16.vlgmr.msrb.gmra.mxu3 %v3475_v14 }
 0x406   :  { %v1339_v31 = vpop.permute.xlu0 %1338  ;;  %v959_v38 = vsel %vm123_vm4, %v943_v49, %v3515_v37  ;;  %v3529_v0 = vsel %vm123_vm4, %v3840_v47, %v3517_v40  ;;  %v3860_v47 = vld [vmem:[#allocation30_spill] sm:$0xff] }
 0x407   :  { %v1352_v57 = vsel %vm344_vm3, %v3447_v18, %v1339_v31  ;;  %v1353_v46 = vsel %vm344_vm3, %v1339_v31, %v2922_v41  ;;  %983 = vst [vmem:[#allocation3 + $0x278] sm:$0xff] %v959_v38  ;;  %v1765_v24 = vpack.c.bf16 %v959_v38, %v3841_v2 }
 0x408   :  { %978 = vst [vmem:[#allocation3 + $0x2c8] sm:$0xff] %v3529_v0  ;;  %v1797_v53 = vpack.c.bf16 %v1353_v46, %v3846_v1 }
 0x409   :  { %1920 = vmatpush.bf16.msra.mxu2 %v1765_v24 }
 0x40c   :  { %1921 = vmatmul.bf16.vlgmr.msra.gmra.mxu2 %v3475_v14 }
 0x40d   :  { %v1611_v10 = vpop.permute.xlu1 %1610  ;;  %v1223_v63 = vpop.permute.xlu2 %1222 }
 0x40e   :  { %v1613_v43 = vpop.permute.xlu0 %1612  ;;  %v1626_v18 = vsel %vm492_vm2, %v1609_v44, %v1611_v10  ;;  %v1236_v41 = vsel %vm278_vm8, %v3467_v19, %v1223_v63  ;;  %v1796_v44 = vpack.c.bf16 %v1352_v57, %v3845_v11  ;;  %v3859_v57 = vld [vmem:[#allocation31_spill] sm:$0xff] }
 0x40f   :  { %v1627_v59 = vsel %vm492_vm2, %v1611_v10, %v1613_v43  ;;  %v1812_v60 = vpack.c.bf16 %v1626_v18, %v3311_v6  ;;  %v3844_v6 = vld [vmem:[#allocation22_spill] sm:$0xff]  ;;  %v1784_v45 = vpack.c.bf16 %v1236_v41, %v3855_v34  ;;  %v3864_v34 = vld [vmem:[#allocation13_spill] sm:$0xff] }
 0x410   :  { %v1813_v32 = vpack.c.bf16 %v1627_v59, %v3842_v27  ;;  %v1803_v22 = vpack.c.bf16 %v1445_v52, %v3844_v6 }
 0x411   :  { %1906 = vmatpush.bf16.msrb.mxu1 %v1812_v60 }
 0x412   :  { %1934 = vmatpush.bf16.msra.mxu0 %v1813_v32 }
 0x414   :  { %2413 = vmatmul.msk.bf16.vlgmr.msrb.gmra.mxu1 %vm1825_vm12, %v3465_v8 }
 0x415   :  { %1941 = vmatpush.bf16.msra.mxu1 %v1808_v50  ;;  %v1225_v19 = vpop.permute.xlu1 %1224  ;;  %v1133_v51 = vpop.permute.xlu2 %1132  ;;  %2414 = vmatmul.msk.bf16.vlgmr.msra.gmra.mxu0 %vm1825_vm12, %v3465_v8 }
 0x416   :  { %1969 = vmatpush.bf16.msrb.mxu0 %v1809_v42  ;;  %v1131_v29 = vpop.permute.xlu0 %1130  ;;  %v1237_v26 = vsel %vm278_vm8, %v1223_v63, %v1225_v19 }
 0x417   :  { %v1144_v54 = vsel %vm224_vm7, %v1129_v12, %v1131_v29  ;;  %v1145_v30 = vsel %vm224_vm7, %v1131_v29, %v1133_v51  ;;  %v3852_v12 = vld [vmem:[#allocation19_spill] sm:$0xff]  ;;  %v1785_v49 = vpack.c.bf16 %v1237_v26, %v3856_v56 }
 0x418   :  { %v3853_v4 = vpack.c.bf16 %v3851_v20, %v3852_v12  ;;  %v1778_v52 = vpack.c.bf16 %v1144_v54, %v3857_v17  ;;  %v3862_v26 = vld [vmem:[#allocation11_spill] sm:$0xff] }
 0x419   :  { %1942 = vmatpush.bf16.msra.mxu1 %v1802_v16 }
 0x41a   :  { %1970 = vmatpush.bf16.msrb.mxu0 %v1803_v22  ;;  %v3861_v22 = vld [vmem:[#allocation10_spill] sm:$0xff] }
 0x41d   :  { %1943 = vmatpush.bf16.msra.mxu1 %v1796_v44  ;;  %v1615_v33 = vpop.permute.xlu1 %1614  ;;  %v949_v9 = vpop.permute.xlu2 %948 }
 0x41e   :  { %1971 = vmatpush.bf16.msrb.mxu0 %v1797_v53  ;;  %v1039_v5 = vpop.permute.xlu0 %1038  ;;  %v1628_v36 = vsel %vm492_vm2, %v1613_v43, %v1615_v33  ;;  %v1629_v28 = vsel %vm492_vm2, %v1615_v33, %v3847_v7 }
 0x41f   :  { %v1052_v48 = vsel %vm177_vm1, %v1037_v61, %v1039_v5  ;;  %v1814_v62 = vpack.c.bf16 %v1628_v36, %v3854_v35  ;;  %v1815_v55 = vpack.c.bf16 %v1629_v28, %v3350_v39  ;;  %v1779_v39 = vpack.c.bf16 %v1145_v30, %v3858_v58  ;;  %v3863_v28 = vld [vmem:[#allocation12_spill] sm:$0xff] }
 0x420   :  { %1076 = vst [vmem:[#allocation3 + $0x90] sm:$0xff] %v1052_v48 }
 0x421   :  { %1944 = vmatpush.bf16.msra.mxu1 %v3850_v21  ;;  %1962 = vmatpush.bf16.msra.mxu3 %v1814_v62 }
 0x422   :  { %1972 = vmatpush.bf16.msrb.mxu0 %v3853_v4  ;;  %1990 = vmatpush.bf16.msrb.mxu2 %v1815_v55 }
 0x424   :  { %2415 = vmatmul.msk.bf16.vlgmr.msra.gmra.mxu3 %vm1825_vm12, %v3465_v8 }
 0x425   :  { %1945 = vmatpush.bf16.msra.mxu1 %v1784_v45  ;;  %2416 = vmatmul.msk.bf16.vlgmr.msrb.gmra.mxu2 %vm1825_vm12, %v3465_v8  ;;  %v1041_v61 = vpop.permute.xlu1 %1040  ;;  %v1772_v8 = vpack.c.bf16 %v1052_v48, %v3860_v47 }
 0x426   :  { %1973 = vmatpush.bf16.msrb.mxu0 %v1785_v49  ;;  %v947_v3 = vpop.permute.xlu0 %946  ;;  %v1053_v13 = vsel %vm177_vm1, %v1039_v5, %v1041_v61 }
 0x427   :  { %v960_v31 = vsel %vm123_vm4, %v3515_v37, %v947_v3  ;;  %v961_v38 = vsel %vm123_vm4, %v947_v3, %v949_v9  ;;  %1077 = vst [vmem:[#allocation3 + $0x248] sm:$0xff] %v1053_v13  ;;  %v1773_v46 = vpack.c.bf16 %v1053_v13, %v3859_v57 }
 0x428   :  { %984 = vst [vmem:[#allocation3 + $0x210] sm:$0xff] %v960_v31  ;;  %v1766_v2 = vpack.c.bf16 %v960_v31, %v3529_v0 }
 0x429   :  { %1946 = vmatpush.bf16.msra.mxu1 %v1778_v52  ;;  %985 = vst [vmem:[#allocation3 + $0x2e8] sm:$0xff] %v961_v38 }
 0x42a   :  { %1974 = vmatpush.bf16.msrb.mxu0 %v1779_v39 }
 0x42d   :  { %1947 = vmatpush.bf16.msra.mxu1 %v1772_v8  ;;  %v935_v24 = vpop.permute.xlu1 %934 }
 0x42e   :  { %1975 = vmatpush.bf16.msrb.mxu0 %v1773_v46  ;;  %v955_v10 = vsel %vm123_vm4, %v3517_v40, %v935_v24  ;;  %v3865_v46 = vld [vmem:[#allocation14_spill] sm:$0xff] }
 0x42f   :  { %979 = vst [vmem:[#allocation3 + $0x8] sm:$0xff] %v955_v10  ;;  %v1767_v37 = vpack.c.bf16 %v961_v38, %v955_v10 }
 0x431   :  { %1948 = vmatpush.bf16.msra.mxu1 %v1766_v2 }
 0x432   :  { %1976 = vmatpush.bf16.msrb.mxu0 %v1767_v37 }
 0x434   :  { %1949 = vmatmul.bf16.vlgmr.msra.gmra.mxu1 %v3475_v14 }
 0x435   :  { %1977 = vmatmul.bf16.vlgmr.msrb.gmra.mxu0 %v3475_v14 }
 0x467   :  { %v1838_v18 = vpop.f32.mrf.mxu2 }
 0x468   :  { %v1852_v63 = vpop.f32.mrf.mxu3 }
 0x469   :  { %v3584_v40 = vadd.f32 %v1852_v63, %v1838_v18 }
 0x46b   :  { %v2023_v19 = vmul.f32 %v3584_v40, %v3584_v40  ;;  %v1997_v29 = vmul.f32 %v3584_v40, %v3861_v22 }
 0x46d   :  { %v2035_v30 = vmul.f32 %v2023_v19, %v3861_v22 }
 0x46f   :  { %v1840_v27 = vpop.f32.mrf.mxu2 }
 0x470   :  { %v1854_v59 = vpop.f32.mrf.mxu3 }
 0x471   :  { %v1866_v41 = vpop.f32.mrf.mxu0  ;;  %v3604_v5 = vadd.f32 %v1854_v59, %v1840_v27  ;;  %v3866_v59 = vld [vmem:[#allocation15_spill] sm:$0xff] }
 0x472   :  { %v1880_v43 = vpop.f32.mrf.mxu1 }
 0x473   :  { %v3586_v25 = vadd.f32 %v1880_v43, %v1866_v41  ;;  %v2029_v4 = vmul.f32 %v3604_v5, %v3604_v5  ;;  %v2003_v56 = vmul.f32 %v3604_v5, %v3861_v22 }
 0x475   :  { %v2024_v14 = vmul.f32 %v3586_v25, %v3586_v25  ;;  %v1998_v54 = vmul.f32 %v3586_v25, %v3862_v26  ;;  %v2041_v13 = vmul.f32 %v2029_v4, %v3861_v22 }
 0x477   :  { %v2036_v11 = vmul.f32 %v2024_v14, %v3862_v26  ;;  %v2009_v7 = vadd.f32 %v1998_v54, %v1997_v29 }
 0x479   :  { %v1868_v0 = vpop.f32.mrf.mxu0  ;;  %v2047_v21 = vadd.f32 %v2036_v11, %v2035_v30 }
 0x47a   :  { %v1882_v60 = vpop.f32.mrf.mxu1 }
 0x47b   :  { %v3606_v36 = vadd.f32 %v1882_v60, %v1868_v0 }
 0x47d   :  { %v2030_v35 = vmul.f32 %v3606_v36, %v3606_v36  ;;  %v2004_v49 = vmul.f32 %v3606_v36, %v3862_v26 }
 0x47f   :  { %v2042_v31 = vmul.f32 %v2030_v35, %v3862_v26  ;;  %v2016_v24 = vadd.f32 %v2004_v49, %v2003_v56 }
 0x481   :  { %v2054_v0 = vadd.f32 %v2042_v31, %v2041_v13 }
 0x488   :  { %v1894_v32 = vpop.f32.mrf.mxu3 }
 0x48f   :  { %v1922_v42 = vpop.f32.mrf.mxu2 }
 0x490   :  { %v1896_v6 = vpop.f32.mrf.mxu3 }
 0x491   :  { %v1908_v50 = vpop.f32.mrf.mxu1 }
 0x492   :  { %v1936_v16 = vpop.f32.mrf.mxu0  ;;  %v3592_v51 = vadd.f32 %v1908_v50, %v1894_v32 }
 0x493   :  { %v3602_v1 = vadd.f32 %v1936_v16, %v1922_v42 }
 0x494   :  { %v2025_v44 = vmul.f32 %v3592_v51, %v3592_v51  ;;  %v1999_v23 = vmul.f32 %v3592_v51, %v3863_v28 }
 0x495   :  { %v2026_v20 = vmul.f32 %v3602_v1, %v3602_v1  ;;  %v2000_v45 = vmul.f32 %v3602_v1, %v3864_v34 }
 0x496   :  { %v2037_v48 = vmul.f32 %v2025_v44, %v3863_v28  ;;  %v2010_v55 = vadd.f32 %v2009_v7, %v1999_v23 }
 0x497   :  { %v1924_v33 = vpop.f32.mrf.mxu2  ;;  %v2038_v52 = vmul.f32 %v2026_v20, %v3864_v34 }
 0x498   :  { %v2048_v17 = vadd.f32 %v2047_v21, %v2037_v48  ;;  %v2011_v38 = vadd.f32 %v2010_v55, %v2000_v45 }
 0x499   :  { %v1910_v53 = vpop.f32.mrf.mxu1 }
 0x49a   :  { %v1938_v15 = vpop.f32.mrf.mxu0  ;;  %v3613_v12 = vadd.f32 %v1910_v53, %v1896_v6  ;;  %v2049_v37 = vadd.f32 %v2048_v17, %v2038_v52 }
 0x49b   :  { %v3628_v39 = vadd.f32 %v1938_v15, %v1924_v33 }
 0x49c   :  { %v2031_v58 = vmul.f32 %v3613_v12, %v3613_v12  ;;  %v2005_v57 = vmul.f32 %v3613_v12, %v3863_v28 }
 0x49d   :  { %v2032_v43 = vmul.f32 %v3628_v39, %v3628_v39  ;;  %v2006_v50 = vmul.f32 %v3628_v39, %v3864_v34 }
 0x49e   :  { %v2043_v63 = vmul.f32 %v2031_v58, %v3863_v28  ;;  %v2017_v32 = vadd.f32 %v2016_v24, %v2005_v57 }
 0x49f   :  { %v2044_v54 = vmul.f32 %v2032_v43, %v3864_v34 }
 0x4a0   :  { %v2055_v29 = vadd.f32 %v2054_v0, %v2043_v63  ;;  %v2018_v44 = vadd.f32 %v2017_v32, %v2006_v50  ;;  %v2069_v32 = vld [vmem:[%s3785_s3] sm:$0xff] }
 0x4a2   :  { %v2056_v20 = vadd.f32 %v2055_v29, %v2044_v54 }
 0x4a7   :  { %v1964_v62 = vpop.f32.mrf.mxu3 }
 0x4a8   :  { %v1992_v3 = vpop.f32.mrf.mxu2 }
 0x4af   :  { %v1966_v16 = vpop.f32.mrf.mxu3 }
 0x4b0   :  { %v1994_v7 = vpop.f32.mrf.mxu2 }
 0x4b1   :  { %v1950_v61 = vpop.f32.mrf.mxu1 }
 0x4b2   :  { %v3630_v9 = vadd.f32 %v1964_v62, %v1950_v61  ;;  %v1978_v2 = vpop.f32.mrf.mxu0 }
 0x4b3   :  { %v3640_v10 = vadd.f32 %v1992_v3, %v1978_v2 }
 0x4b4   :  { %v2001_v47 = vmul.f32 %v3630_v9, %v3865_v46  ;;  %v2027_v8 = vmul.f32 %v3630_v9, %v3630_v9 }
 0x4b5   :  { %v2002_v60 = vmul.f32 %v3640_v10, %v3866_v59  ;;  %v2028_v27 = vmul.f32 %v3640_v10, %v3640_v10 }
 0x4b6   :  { %v2039_v18 = vmul.f32 %v2027_v8, %v3865_v46  ;;  %v2012_v41 = vadd.f32 %v2011_v38, %v2001_v47 }
 0x4b7   :  { %v2040_v6 = vmul.f32 %v2028_v27, %v3866_v59 }
 0x4b8   :  { %v2050_v42 = vadd.f32 %v2049_v37, %v2039_v18  ;;  %v2013_v14 = vadd.f32 %v2012_v41, %v2002_v60 }
 0x4b9   :  { %v1952_v19 = vpop.f32.mrf.mxu1 }
 0x4ba   :  { %v3654_v30 = vadd.f32 %v1966_v16, %v1952_v19  ;;  %2014 = vadd.xlane.f32.xlu0 %v2013_v14  ;;  %v2051_v11 = vadd.f32 %v2050_v42, %v2040_v6  ;;  %v1980_v23 = vpop.f32.mrf.mxu0  ;;  %v2095_v14 = vld [vmem:[%s3786_s4] sm:$0xff] }
 0x4bb   :  { %v3660_v15 = vadd.f32 %v1994_v7, %v1980_v23  ;;  %v2096_v7 = vld [vmem:[%s3786_s4 + $0x8] sm:$0xff] }
 0x4bc   :  { %v2007_v53 = vmul.f32 %v3654_v30, %v3865_v46  ;;  %v2033_v33 = vmul.f32 %v3654_v30, %v3654_v30  ;;  %2052 = vadd.xlane.f32.xlu1 %v2051_v11 }
 0x4bd   :  { %v2008_v4 = vmul.f32 %v3660_v15, %v3866_v59  ;;  %v2034_v35 = vmul.f32 %v3660_v15, %v3660_v15 }
 0x4be   :  { %v2045_v21 = vmul.f32 %v2033_v33, %v3865_v46  ;;  %v2019_v48 = vadd.f32 %v2018_v44, %v2007_v53  ;;  %v2070_v44 = vld [vmem:[%s3785_s3 + $0x8] sm:$0xff] }
 0x4bf   :  { %v2046_v45 = vmul.f32 %v2034_v35, %v3866_v59 }
 0x4c0   :  { %v2057_v62 = vadd.f32 %v2056_v20, %v2045_v21  ;;  %v2020_v55 = vadd.f32 %v2019_v48, %v2008_v4 }
 0x4c2   :  { %2021 = vadd.xlane.f32.xlu2 %v2020_v55  ;;  %v2058_v56 = vadd.f32 %v2057_v62, %v2046_v45 }
 0x4c4   :  { %2059 = vadd.xlane.f32.xlu0 %v2058_v56 }
 0x52d   :  { %v2015_v49 = vpop.xlane.xlu0 %2014 }
 0x52e   :  { %v2061_v17 = vmul.f32 0.001953125, %v2015_v49 }
 0x52f   :  { %v2053_v52 = vpop.xlane.xlu1 %2052 }
 0x530   :  { %v2065_v61 = vmul.f32 %v2061_v17, %v2061_v17  ;;  %v2063_v58 = vmul.f32 0.001953125, %v2053_v52 }
 0x532   :  { %v2067_v3 = vsub.f32 %v2063_v58, %v2065_v61 }
 0x534   :  { %v2071_v13 = vadd.f32 1e-05, %v2067_v3 }
 0x535   :  { %v2022_v31 = vpop.xlane.xlu2 %2021 }
 0x536   :  { %2441 = vrsqrt.f32 %v2071_v13  ;;  %v2062_v38 = vmul.f32 0.001953125, %v2022_v31  ;;  %vm2079_vm1 = vweird.f32 %v2071_v13 }
 0x537   :  { %v2060_v57 = vpop.xlane.xlu0 %2059 }
 0x538   :  { %v2066_v47 = vmul.f32 %v2062_v38, %v2062_v38  ;;  %v2064_v8 = vmul.f32 0.001953125, %v2060_v57 }
 0x53a   :  { %v2068_v2 = vsub.f32 %v2064_v8, %v2066_v47 }
 0x53c   :  { %v2442_v24 = vpop.eup %2441  ;;  %v2072_v37 = vadd.f32 1e-05, %v2068_v2 }
 0x53d   :  { %v2074_v63 = vmul.f32 %v2442_v24, %v2071_v13  ;;  %vm2080_vm0 = vweird.f32 %v2442_v24 }
 0x53e   :  { %2443 = vrsqrt.f32 %v2072_v37  ;;  %vm2081_vm2 = vmor %vm2079_vm1, %vm2080_vm0  ;;  %vm2089_vm4 = vweird.f32 %v2072_v37 }
 0x53f   :  { %v2075_v43 = vmul.f32 %v2442_v24, %v2074_v63 }
 0x541   :  { %v2076_v18 = vmul.f32 0.5, %v2075_v43 }
 0x543   :  { %v2077_v41 = vsub.f32 1.5, %v2076_v18 }
 0x544   :  { %v2444_v60 = vpop.eup %2443 }
 0x545   :  { %v2078_v27 = vmul.f32 %v2442_v24, %v2077_v41  ;;  %v2084_v0 = vmul.f32 %v2444_v60, %v2072_v37  ;;  %vm2090_vm3 = vweird.f32 %v2444_v60 }
 0x546   :  { %vm2091_vm5 = vmor %vm2089_vm4, %vm2090_vm3 }
 0x547   :  { %v2085_v50 = vmul.f32 %v2444_v60, %v2084_v0  ;;  %v2082_v42 = vsel %vm2081_vm2, %v2442_v24, %v2078_v27  ;;  %vm2253_vm2 = vcmask 1043456  }
 0x548   :  { %v2093_v16 = vmul.f32 %v2082_v42, %v2069_v32 }
 0x549   :  { %v2086_v19 = vmul.f32 0.5, %v2085_v50 }
 0x54a   :  { %2103 = vperm.xlu1 %2435, %v2093_v16   ;;  %v2097_v6 = vmul.f32 %v2093_v16, %v2061_v17 }
 0x54b   :  { %v2087_v29 = vsub.f32 1.5, %v2086_v19 }
 0x54c   :  { %v2099_v54 = vsub.f32 %v2095_v14, %v2097_v6 }
 0x54d   :  { %v2088_v11 = vmul.f32 %v2444_v60, %v2087_v29 }
 0x54e   :  { %2125 = vperm.xlu2 %2434, %v2099_v54  }
 0x54f   :  { %v2092_v53 = vsel %vm2091_vm5, %v2444_v60, %v2088_v11 }
 0x550   :  { %v2094_v33 = vmul.f32 %v2092_v53, %v2070_v44 }
 0x552   :  { %2108 = vperm.xlu0 %2436, %v2094_v33   ;;  %v2098_v23 = vmul.f32 %v2094_v33, %v2062_v38 }
 0x554   :  { %v2100_v21 = vsub.f32 %v2096_v7, %v2098_v23 }
 0x556   :  { %2130 = vperm.xlu1 %2435, %v2100_v21  }
 0x5a8   :  { %v2126_v55 = vpop.permute.xlu2 %2125 }
 0x5bc   :  { %v2104_v48 = vpop.permute.xlu1 %2103 }
 0x5bd   :  { %v2111_v20 = vmul.f32 %v2104_v48, %v3584_v40  ;;  %v2112_v4 = vmul.f32 %v2104_v48, %v3586_v25  ;;  %v2113_v35 = vmul.f32 %v2104_v48, %v3592_v51  ;;  %v2114_v62 = vmul.f32 %v2104_v48, %v3602_v1 }
 0x5be   :  { %v2115_v45 = vmul.f32 %v2104_v48, %v3630_v9  ;;  %v2116_v56 = vmul.f32 %v2104_v48, %v3640_v10 }
 0x5bf   :  { %v2133_v49 = vadd.f32 %v2126_v55, %v2111_v20  ;;  %v2134_v17 = vadd.f32 %v2126_v55, %v2112_v4  ;;  %v2135_v52 = vadd.f32 %v2126_v55, %v2113_v35  ;;  %v2136_v61 = vadd.f32 %v2126_v55, %v2114_v62 }
 0x5c0   :  { %v2137_v58 = vadd.f32 %v2126_v55, %v2115_v45  ;;  %v2138_v3 = vadd.f32 %v2126_v55, %v2116_v56 }
 0x5c1   :  { %vm2145_vm7 = vcmp.ge.f32.partialorder %v2133_v49, 0.0  ;;  %vm2146_vm8 = vcmp.ge.f32.partialorder %v2134_v17, 0.0  ;;  %vm2147_vm13 = vcmp.ge.f32.partialorder %v2135_v52, 0.0  ;;  %vm2148_vm14 = vcmp.ge.f32.partialorder %v2136_v61, 0.0 }
 0x5c2   :  { %vm2149_vm15 = vcmp.ge.f32.partialorder %v2137_v58, 0.0  ;;  %vm2150_vm6 = vcmp.ge.f32.partialorder %v2138_v3, 0.0  ;;  %v2157_v40 = vmul.f32 0.2, %v2133_v49  ;;  %v2158_v25 = vmul.f32 0.2, %v2134_v17 }
 0x5c3   :  { %v2159_v51 = vmul.f32 0.2, %v2135_v52  ;;  %v2160_v1 = vmul.f32 0.2, %v2136_v61  ;;  %v2161_v13 = vmul.f32 0.2, %v2137_v58 }
 0x5c4   :  { %v2162_v9 = vmul.f32 0.2, %v2138_v3  ;;  %v2169_v31 = vsel %vm2145_vm7, %v2133_v49, %v2157_v40  ;;  %v2170_v10 = vsel %vm2146_vm8, %v2134_v17, %v2158_v25  ;;  %v2109_v38 = vpop.permute.xlu0 %2108 }
 0x5c5   :  { %v2171_v57 = vsel %vm2147_vm13, %v2135_v52, %v2159_v51  ;;  %v2172_v47 = vsel %vm2148_vm14, %v2136_v61, %v2160_v1  ;;  %v2173_v8 = vsel %vm2149_vm15, %v2137_v58, %v2161_v13  ;;  %v2181_v2 = vmul.f32 %v2169_v31, %v3861_v22 }
 0x5c6   :  { %v2174_v24 = vsel %vm2150_vm6, %v2138_v3, %v2162_v9  ;;  %v2182_v37 = vmul.f32 %v2170_v10, %v3862_v26  ;;  %v2183_v63 = vmul.f32 %v2171_v57, %v3863_v28  ;;  %v2184_v43 = vmul.f32 %v2172_v47, %v3864_v34 }
 0x5c7   :  { %v2185_v18 = vmul.f32 %v2173_v8, %v3865_v46  ;;  %v2199_v41 = vrot.slane %v2181_v2, 4  ;;  %v2117_v60 = vmul.f32 %v2109_v38, %v3604_v5  ;;  %v2118_v27 = vmul.f32 %v2109_v38, %v3606_v36 }
 0x5c8   :  { %v2200_v0 = vrot.slane %v2182_v37, 4  ;;  %v2201_v32 = vrot.slane %v2183_v63, 4  ;;  %v2202_v50 = vrot.slane %v2184_v43, 4  ;;  %v2119_v42 = vmul.f32 %v2109_v38, %v3613_v12  ;;  %v2131_v16 = vpop.permute.xlu1 %2130 }
 0x5c9   :  { %v2120_v19 = vmul.f32 %v2109_v38, %v3628_v39  ;;  %v2121_v14 = vmul.f32 %v2109_v38, %v3654_v30  ;;  %v2122_v6 = vmul.f32 %v2109_v38, %v3660_v15  ;;  %v2139_v29 = vadd.f32 %v2131_v16, %v2117_v60 }
 0x5ca   :  { %v2140_v54 = vadd.f32 %v2131_v16, %v2118_v27  ;;  %v2141_v11 = vadd.f32 %v2131_v16, %v2119_v42  ;;  %v2211_v44 = vmax.f32 %v2181_v2, %v2199_v41  ;;  %v2212_v53 = vmax.f32 %v2182_v37, %v2200_v0 }
 0x5cb   :  { %v2142_v5 = vadd.f32 %v2131_v16, %v2120_v19  ;;  %v2143_v33 = vadd.f32 %v2131_v16, %v2121_v14  ;;  %v2144_v36 = vadd.f32 %v2131_v16, %v2122_v6  ;;  %vm2151_vm9 = vcmp.ge.f32.partialorder %v2139_v29, 0.0 }
 0x5cc   :  { %vm2152_vm10 = vcmp.ge.f32.partialorder %v2140_v54, 0.0  ;;  %vm2153_vm11 = vcmp.ge.f32.partialorder %v2141_v11, 0.0  ;;  %v2163_v7 = vmul.f32 0.2, %v2139_v29  ;;  %v2164_v12 = vmul.f32 0.2, %v2140_v54 }
 0x5cd   :  { %vm2154_vm12 = vcmp.ge.f32.partialorder %v2142_v5, 0.0  ;;  %vm2155_vm0 = vcmp.ge.f32.partialorder %v2143_v33, 0.0  ;;  %vm2156_vm1 = vcmp.ge.f32.partialorder %v2144_v36, 0.0  ;;  %v2165_v39 = vmul.f32 0.2, %v2141_v11 }
 0x5ce   :  { %v2166_v30 = vmul.f32 0.2, %v2142_v5  ;;  %v2167_v23 = vmul.f32 0.2, %v2143_v33  ;;  %v2168_v15 = vmul.f32 0.2, %v2144_v36  ;;  %v2175_v21 = vsel %vm2151_vm9, %v2139_v29, %v2163_v7 }
 0x5cf   :  { %v2176_v48 = vsel %vm2152_vm10, %v2140_v54, %v2164_v12  ;;  %v2177_v20 = vsel %vm2153_vm11, %v2141_v11, %v2165_v39  ;;  %v2187_v4 = vmul.f32 %v2175_v21, %v3861_v22  ;;  %v2213_v35 = vmax.f32 %v2183_v63, %v2201_v32 }
 0x5d0   :  { %v2178_v62 = vsel %vm2154_vm12, %v2142_v5, %v2166_v30  ;;  %v2179_v55 = vsel %vm2155_vm0, %v2143_v33, %v2167_v23  ;;  %v2180_v45 = vsel %vm2156_vm1, %v2144_v36, %v2168_v15  ;;  %v2188_v56 = vmul.f32 %v2176_v48, %v3862_v26 }
 0x5d1   :  { %v2189_v49 = vmul.f32 %v2177_v20, %v3863_v28  ;;  %v2190_v17 = vmul.f32 %v2178_v62, %v3864_v34  ;;  %v2191_v52 = vmul.f32 %v2179_v55, %v3865_v46  ;;  %v2217_v61 = vmax.f32 %v2211_v44, %v2187_v4 }
 0x5d2   :  { %v2218_v58 = vmax.f32 %v2212_v53, %v2188_v56  ;;  %v2229_v3 = vrot.slane %v2187_v4, 4  ;;  %v2230_v40 = vrot.slane %v2188_v56, 4  ;;  %v2186_v25 = vmul.f32 %v2174_v24, %v3866_v59 }
 0x5d3   :  { %v2219_v51 = vmax.f32 %v2213_v35, %v2189_v49  ;;  %v2231_v1 = vrot.slane %v2189_v49, 4  ;;  %v2192_v13 = vmul.f32 %v2180_v45, %v3866_v59  ;;  %v2203_v9 = vrot.slane %v2185_v18, 4 }
 0x5d4   :  { %v2204_v31 = vrot.slane %v2186_v25, 4  ;;  %v2214_v10 = vmax.f32 %v2184_v43, %v2202_v50  ;;  %v2232_v38 = vrot.slane %v2190_v17, 4  ;;  %v2233_v47 = vrot.slane %v2191_v52, 4 }
 0x5d5   :  { %v2215_v57 = vmax.f32 %v2185_v18, %v2203_v9  ;;  %v3704_v8 = vmax.f32 %v2217_v61, %v2229_v3  ;;  %v3706_v2 = vmax.f32 %v2218_v58, %v2230_v40  ;;  %v2234_v41 = vrot.slane %v2192_v13, 4 }
 0x5d6   :  { %v2216_v37 = vmax.f32 %v2186_v25, %v2204_v31  ;;  %v2220_v63 = vmax.f32 %v2214_v10, %v2190_v17  ;;  %v3708_v60 = vmax.f32 %v2219_v51, %v2231_v1 }
 0x5d7   :  { %v2221_v24 = vmax.f32 %v2215_v57, %v2191_v52  ;;  %v2247_v27 = vmul.f32 %v3704_v8, %v3861_v22  ;;  %v2248_v43 = vmul.f32 %v3706_v2, %v3862_v26  ;;  %v2267_v18 = vmul.f32 %v3704_v8, %v3704_v8 }
 0x5d8   :  { %v2222_v0 = vmax.f32 %v2216_v37, %v2192_v13  ;;  %v3716_v32 = vmax.f32 %v2220_v63, %v2232_v38  ;;  %v2249_v50 = vmul.f32 %v3708_v60, %v3863_v28  ;;  %v2268_v42 = vmul.f32 %v3706_v2, %v3706_v2 }
 0x5d9   :  { %v3722_v16 = vmax.f32 %v2221_v24, %v2233_v47  ;;  %v2254_v19 = vsel %vm2253_vm2, %v2247_v27, 0.0  ;;  %v2255_v14 = vsel %vm2253_vm2, %v2248_v43, 0.0  ;;  %v2269_v6 = vmul.f32 %v3708_v60, %v3708_v60 }
 0x5da   :  { %v3728_v29 = vmax.f32 %v2222_v0, %v2234_v41  ;;  %v2250_v54 = vmul.f32 %v3716_v32, %v3864_v34  ;;  %v2256_v11 = vadd.f32 %v2255_v14, %v2254_v19  ;;  %v2257_v53 = vsel %vm2253_vm2, %v2249_v50, 0.0  ;;  %v2309_v19 = vld [vmem:[%s3788_s6] sm:$0xf] }
 0x5db   :  { %v2251_v44 = vmul.f32 %v3722_v16, %v3865_v46  ;;  %v2270_v5 = vmul.f32 %v3716_v32, %v3716_v32  ;;  %v2273_v33 = vmul.f32 %v2267_v18, %v3861_v22  ;;  %v2271_v7 = vmul.f32 %v3722_v16, %v3722_v16  ;;  %v2296_v18 = vld [vmem:[%s3787_s5] sm:$0xf]  ;;  %s2512_s5 = smov [#allocation7]  }
 0x5dc   :  { %v2258_v36 = vadd.f32 %v2257_v53, %v2256_v11  ;;  %v2252_v12 = vmul.f32 %v3728_v29, %v3866_v59  ;;  %v2259_v39 = vsel %vm2253_vm2, %v2250_v54, 0.0  ;;  %v2274_v30 = vmul.f32 %v2268_v42, %v3862_v26  ;;  %s2381_s6 = sshll.u32 %s2512_s5, 4  ;;  %s2382_s6 = int_to_ptr.vmem [resolvable:$true] %s2381_s6 }
 0x5dd   :  { %v2275_v23 = vmul.f32 %v2269_v6, %v3863_v28  ;;  %v2272_v21 = vmul.f32 %v3728_v29, %v3728_v29  ;;  %v2261_v48 = vsel %vm2253_vm2, %v2251_v44, 0.0  ;;  %v2276_v20 = vmul.f32 %v2270_v5, %v3864_v34 }
 0x5de   :  { %v2260_v15 = vadd.f32 %v2259_v39, %v2258_v36  ;;  %v2279_v4 = vsel %vm2253_vm2, %v2273_v33, 0.0  ;;  %v2280_v35 = vsel %vm2253_vm2, %v2274_v30, 0.0  ;;  %v2263_v45 = vsel %vm2253_vm2, %v2252_v12, 0.0 }
 0x5df   :  { %v2281_v55 = vadd.f32 %v2280_v35, %v2279_v4  ;;  %v2277_v56 = vmul.f32 %v2271_v7, %v3865_v46  ;;  %v2282_v49 = vsel %vm2253_vm2, %v2275_v23, 0.0  ;;  %v2278_v61 = vmul.f32 %v2272_v21, %v3866_v59 }
 0x5e0   :  { %v2262_v62 = vadd.f32 %v2261_v48, %v2260_v15  ;;  %v2284_v58 = vsel %vm2253_vm2, %v2276_v20, 0.0 }
 0x5e1   :  { %v2283_v52 = vadd.f32 %v2282_v49, %v2281_v55  ;;  %v2286_v40 = vsel %vm2253_vm2, %v2277_v56, 0.0  ;;  %v2288_v51 = vsel %vm2253_vm2, %v2278_v61, 0.0 }
 0x5e2   :  { %v2264_v17 = vadd.f32 %v2263_v45, %v2262_v62 }
 0x5e3   :  { %v2285_v3 = vadd.f32 %v2284_v58, %v2283_v52 }
 0x5e4   :  { %2265 = vadd.xlane.f32.xlu0 %v2264_v17 }
 0x5e5   :  { %v2287_v25 = vadd.f32 %v2286_v40, %v2285_v3 }
 0x5e7   :  { %v2289_v1 = vadd.f32 %v2288_v51, %v2287_v25 }
 0x5e9   :  { %2290 = vadd.xlane.f32.xlu2 %v2289_v1 }
 0x657   :  { %v2266_v13 = vpop.xlane.xlu0 %2265 }
 0x658   :  { %v2292_v9 = vmul.f32 0.001953125, %v2266_v13 }
 0x65a   :  { %v2294_v31 = vmul.f32 %v2292_v9, %v2292_v9 }
 0x65c   :  { %v2291_v10 = vpop.xlane.xlu2 %2290 }
 0x65d   :  { %v2293_v38 = vmul.f32 0.001953125, %v2291_v10 }
 0x65f   :  { %v2295_v57 = vsub.f32 %v2293_v38, %v2294_v31 }
 0x661   :  { %v2297_v47 = vadd.f32 1e-05, %v2295_v57 }
 0x663   :  { %2445 = vrsqrt.f32 %v2297_v47  ;;  %vm2304_vm4 = vweird.f32 %v2297_v47 }
 0x669   :  { %v2446_v37 = vpop.eup %2445 }
 0x66a   :  { %v2299_v63 = vmul.f32 %v2446_v37, %v2297_v47  ;;  %vm2305_vm3 = vweird.f32 %v2446_v37 }
 0x66b   :  { %vm2306_vm5 = vmor %vm2304_vm4, %vm2305_vm3 }
 0x66c   :  { %v2300_v41 = vmul.f32 %v2446_v37, %v2299_v63 }
 0x66e   :  { %v2301_v24 = vmul.f32 0.5, %v2300_v41 }
 0x670   :  { %v2302_v27 = vsub.f32 1.5, %v2301_v24 }
 0x672   :  { %v2303_v43 = vmul.f32 %v2446_v37, %v2302_v27 }
 0x674   :  { %v2307_v0 = vsel %vm2306_vm5, %v2446_v37, %v2303_v43 }
 0x675   :  { %v2308_v50 = vmul.f32 %v2307_v0, %v2296_v18 }
 0x677   :  { %2314 = vperm.xlu1 %2435, %v2308_v50   ;;  %v2310_v42 = vmul.f32 %v2308_v50, %v2292_v9 }
 0x679   :  { %v2311_v14 = vsub.f32 %v2309_v19, %v2310_v42 }
 0x67f   :  { %2325 = vperm.xlu1 %2435, %v2311_v14  }
 0x6e9   :  { %v2315_v6 = vpop.permute.xlu1 %2314 }
 0x6ea   :  { %v2317_v54 = vmul.f32 %v2315_v6, %v3704_v8  ;;  %v2318_v11 = vmul.f32 %v2315_v6, %v3706_v2  ;;  %v2319_v44 = vmul.f32 %v2315_v6, %v3708_v60  ;;  %v2320_v53 = vmul.f32 %v2315_v6, %v3716_v32 }
 0x6eb   :  { %v2321_v5 = vmul.f32 %v2315_v6, %v3722_v16  ;;  %v2322_v33 = vmul.f32 %v2315_v6, %v3728_v29 }
 0x6f1   :  { %v2326_v36 = vpop.permute.xlu1 %2325 }
 0x6f2   :  { %v2328_v7 = vadd.f32 %v2326_v36, %v2317_v54  ;;  %v2329_v12 = vadd.f32 %v2326_v36, %v2318_v11  ;;  %v2330_v39 = vadd.f32 %v2326_v36, %v2319_v44  ;;  %v2331_v30 = vadd.f32 %v2326_v36, %v2320_v53 }
 0x6f3   :  { %v2332_v23 = vadd.f32 %v2326_v36, %v2321_v5  ;;  %v2333_v15 = vadd.f32 %v2326_v36, %v2322_v33 }
 0x6f4   :  { %vm2334_vm7 = vcmp.ge.f32.partialorder %v2328_v7, 0.0  ;;  %vm2335_vm8 = vcmp.ge.f32.partialorder %v2329_v12, 0.0  ;;  %vm2336_vm13 = vcmp.ge.f32.partialorder %v2330_v39, 0.0  ;;  %vm2337_vm14 = vcmp.ge.f32.partialorder %v2331_v30, 0.0 }
 0x6f5   :  { %vm2338_vm15 = vcmp.ge.f32.partialorder %v2332_v23, 0.0  ;;  %vm2339_vm6 = vcmp.ge.f32.partialorder %v2333_v15, 0.0  ;;  %v2340_v8 = vmul.f32 0.2, %v2328_v7  ;;  %v2341_v2 = vmul.f32 0.2, %v2329_v12 }
 0x6f6   :  { %v2342_v60 = vmul.f32 0.2, %v2330_v39  ;;  %v2343_v32 = vmul.f32 0.2, %v2331_v30  ;;  %v2344_v16 = vmul.f32 0.2, %v2332_v23 }
 0x6f7   :  { %v2345_v21 = vmul.f32 0.2, %v2333_v15  ;;  %v2346_v29 = vsel %vm2334_vm7, %v2328_v7, %v2340_v8  ;;  %v2347_v48 = vsel %vm2335_vm8, %v2329_v12, %v2341_v2 }
 0x6f8   :  { %v2348_v20 = vsel %vm2336_vm13, %v2330_v39, %v2342_v60  ;;  %v2349_v4 = vsel %vm2337_vm14, %v2331_v30, %v2343_v32  ;;  %v2353_v35 = vmul.f32 %v2347_v48, %v3862_v26  ;;  %v2350_v62 = vsel %vm2338_vm15, %v2332_v23, %v2344_v16 }
 0x6f9   :  { %v2351_v55 = vsel %vm2339_vm6, %v2333_v15, %v2345_v21  ;;  %v2355_v45 = vmul.f32 %v2349_v4, %v3864_v34  ;;  %v2352_v49 = vmul.f32 %v2346_v29, %v3861_v22  ;;  %v2354_v52 = vmul.f32 %v2348_v20, %v3863_v28 }
 0x6fa   :  { %v2357_v56 = vmul.f32 %v2351_v55, %v3866_v59  ;;  %v2364_v17 = vrot.slane %v2353_v35, 4  ;;  %v2356_v26 = vmul.f32 %v2350_v62, %v3865_v46 }
 0x6fb   :  { %v2365_v61 = vrot.slane %v2355_v45, 4 }
 0x6fc   :  { %v2366_v58 = vrot.slane %v2357_v56, 4  ;;  %v2367_v3 = vsel %vm2253_vm2, %v2352_v49, %v2364_v17 }
 0x6fd   :  { %v2368_v34 = vsel %vm2253_vm2, %v2354_v52, %v2365_v61  ;;  %2373 = vst [vmem:[#allocation7] sm:$0xff] %v2367_v3 }
 0x6fe   :  { %v2369_v22 = vsel %vm2253_vm2, %v2356_v26, %v2366_v58  ;;  %2374 = vst [vmem:[#allocation7 + $0x8] sm:$0xff] %v2368_v34 }
 0x6ff   :  { %2375 = vst [vmem:[#allocation7 + $0x10] sm:$0xff] %v2369_v22 }
 0x700   :  { %2386 = dma.vmem_to_hbm [thread:$0]  %s2382_s6, 384, %s2384_s22, [#allocation6]  }
 0x701   :  { %2497 = dma.done.wait [#allocation6], 384  }
 0x702   :  { %2498 = vsyncadd [#allocation6], 4294966912 }
 0x703   :  { %2391 = vsyncpa [#allocation5], 1 }
 0x704   :  { %2392 = vsyncpa [#allocation6], 1 }

</bundles_post_ra>
